<compile_context>
chip_gen: v7x
topology: tpu7x:2x2x1
jax: 0.10.0
libtpu: 0.0.40
codegen_flags: <defaults>
</compile_context>

<pallas_src>
import functools

import jax
import jax.numpy as jnp
from jax import lax
from jax.experimental import pallas as pl
from jax.experimental.pallas import tpu as pltpu

# ----------------------------------------------------------------------------
# Tiling: pick the biggest row tile that keeps the worst-case double-buffered
# footprint (2 streams x 2 buffers x tile ~ 8 MiB at a 2 MiB tile) large enough
# to hit the HBM roofline (per-grid-step overhead ~0.35 us) yet inside the
# scoped-VMEM defaults of v5e (16 MiB) / v6e (32 MiB) / v7x (32 MiB scoped,
# 64 MiB physical).  We still raise the limit to 32 MiB for headroom.
# ----------------------------------------------------------------------------
_TARGET_TILE_BYTES = 2 * 1024 * 1024
_VMEM_LIMIT_BYTES = 32 * 1024 * 1024


def _pick_row_tile(n_rows, n_cols, itemsize=4, target=_TARGET_TILE_BYTES):
    if n_rows * n_cols * itemsize <= target:
        return n_rows                          # whole array fits in one block
    cap = max(8, target // (n_cols * itemsize))
    best, t = None, 8
    while t <= cap:                            # largest multiple of 8 dividing N
        if n_rows % t == 0:
            best = t
        t += 8
    # TODO(synk): for very wide M (a single row > target bytes) also tile the lane dim.
    return best if best is not None else n_rows


def _edge_keys(m, dp, g, seed, row0, n_cols):
    """Per-edge exponential-race key; -inf for non-edges.

    key = log(u) * (1/p) with 1/p = 1 + exp(-dp*(1-w) + g*w)  (exact torch
    formula for the sigmoid drop probability).  Larger key == dropped earlier.
    u is derived from a lowbias32-style hash of (seed, global element index),
    so both kernels recompute identical keys (pure VPU/EUP work, no HBM).
    """
    shape = m.shape
    rows = lax.broadcasted_iota(jnp.int32, shape, 0) + row0
    cols = lax.broadcasted_iota(jnp.int32, shape, 1)
    gid = (rows * n_cols + cols).astype(jnp.uint32)

    x = gid + seed.astype(jnp.uint32) * jnp.uint32(0x9E3779B1)
    x = x ^ (x >> 16)
    x = x * jnp.uint32(0x21F0AAAD)
    x = x ^ (x >> 15)
    x = x * jnp.uint32(0x735A2D97)
    x = x ^ (x >> 15)

    # 23 high bits -> u strictly inside (0, 1), so log(u) is finite and < 0.
    hi = (x >> 9).astype(jnp.int32).astype(jnp.float32)
    u = (hi + 0.5) * jnp.float32(1.0 / 8388608.0)

    # 1/p = 1 + exp(-drop_param*(1-w) + gamma*w)  -- matches the module exactly.
    inv_p = 1.0 + jnp.exp(-dp * (1.0 - m) + g * m)
    key = jnp.log(u) * inv_p
    return jnp.where(m != 0.0, key, -jnp.inf)


def _keys_kernel(dp_ref, gamma_ref, seed_ref, mat_ref, key_ref, cnt_ref, *, n_cols, tm):
    """Pass 1 (streaming): per-edge keys + fused per-tile nonzero-edge count."""
    m = mat_ref[...]
    row0 = pl.program_id(0) * tm
    key_ref[...] = _edge_keys(m, dp_ref[0], gamma_ref[0], seed_ref[0], row0, n_cols)
    cnt_ref[0, 0] = jnp.sum((m != 0.0).astype(jnp.int32))


def _drop_kernel(dp_ref, gamma_ref, seed_ref, thresh_ref, mat_ref, out_ref, *, n_cols, tm):
    """Pass 2 (streaming): recompute keys bit-exactly and zero selected edges."""
    m = mat_ref[...]
    row0 = pl.program_id(0) * tm
    key = _edge_keys(m, dp_ref[0], gamma_ref[0], seed_ref[0], row0, n_cols)
    out_ref[...] = jnp.where(key >= thresh_ref[0], 0.0, m)


@functools.partial(jax.jit, static_argnames=("drop_ratio",))
def adaptive_edge_dropping(matrix, drop_param, gamma, seed, *, drop_ratio):
    N, M = matrix.shape
    assert M % 128 == 0, "last dim must be a multiple of 128 lanes"
    assert matrix.dtype == jnp.float32

    tm = _pick_row_tile(N, M)
    grid = (N // tm,)

    smem = pl.BlockSpec(memory_space=pltpu.MemorySpace.SMEM)
    tile = pl.BlockSpec((tm, M), lambda i: (i, 0))
    cnt_spec = pl.BlockSpec((1, 1), lambda i: (i, 0),
                            memory_space=pltpu.MemorySpace.SMEM)
    cparams = pltpu.CompilerParams(
        dimension_semantics=("parallel",),      # row tiles independent -> megacore OK
        vmem_limit_bytes=_VMEM_LIMIT_BYTES)

    # Pass 1: read matrix once, write keys + a tiny per-tile nnz count (the
    # standalone jnp.sum(matrix != 0) HBM pass is fused away).
    keys, counts = pl.pallas_call(
        functools.partial(_keys_kernel, n_cols=M, tm=tm),
        grid=grid,
        in_specs=[smem, smem, smem, tile],
        out_specs=(tile, cnt_spec),
        out_shape=(jax.ShapeDtypeStruct((N, M), jnp.float32),
                   jax.ShapeDtypeStruct((grid[0], 1), jnp.int32)),
        compiler_params=cparams,
    )(drop_param, gamma, seed, matrix)

    # Threshold = k-th largest key.  k is data dependent; bound it by the static
    # k_max and use top_k selection instead of a full O(NM log NM) sort.
    num_edges = jnp.sum(counts)
    k = jnp.floor(num_edges.astype(jnp.float32) * drop_ratio).astype(jnp.int32)
    k_max = max(int(N * M * drop_ratio), 1)
    top_vals, _ = lax.top_k(keys.reshape(-1), k_max)            # descending
    kth = lax.dynamic_index_in_dim(top_vals, jnp.clip(k - 1, 0, k_max - 1),
                                   keepdims=False)
    thresh = jnp.where(k > 0, kth, jnp.inf).astype(jnp.float32).reshape(1)

    # Pass 2: zero the selected edges.  Keys are recomputed in-kernel from the
    # same hash (bit-exact), so this pass streams only matrix-in / matrix-out
    # (8 B/elem instead of 12 B/elem).
    # NOTE: input_output_aliases={4: 0} would reuse the matrix HBM buffer, but it
    # only pays off when the caller donates `matrix`; with a live input XLA would
    # insert a defensive copy, so it is intentionally left off here.
    dropped = pl.pallas_call(
        functools.partial(_drop_kernel, n_cols=M, tm=tm),
        grid=grid,
        in_specs=[smem, smem, smem, smem, tile],
        out_specs=tile,
        out_shape=jax.ShapeDtypeStruct((N, M), matrix.dtype),
        compiler_params=cparams,
    )(drop_param, gamma, seed, thresh, matrix)
    return dropped


if __name__ == "__main__":
    key0 = jax.random.PRNGKey(0)
    k1, k2, k3, k4 = jax.random.split(key0, 4)

    N, M = 128, 128
    # Sparse weighted adjacency with ~30% nonzero entries in (0, 1].
    vals = jax.random.uniform(k1, (N, M), jnp.float32, minval=0.05, maxval=1.0)
    nz_mask = jax.random.uniform(k2, (N, M)) < 0.3
    matrix = jnp.where(nz_mask, vals, 0.0)

    # Deterministic "parameters" (torch.randn(1) equivalents) + RNG seed.
    drop_param = jax.random.normal(k3, (1,), jnp.float32)
    gamma = jax.random.normal(k4, (1,), jnp.float32)
    seed = jnp.array([42], jnp.int32)
    drop_ratio = 0.3

    out = adaptive_edge_dropping(matrix, drop_param, gamma, seed,
                                 drop_ratio=drop_ratio)
    out = jax.block_until_ready(out)

    # Sanity: edges are only ever zeroed (never created / re-weighted), and at
    # least k = int(num_edges * drop_ratio) of them are dropped.
    assert out.shape == matrix.shape
    assert bool(jnp.all((out == matrix) | (out == 0.0)))
    assert bool(jnp.all((matrix != 0.0) | (out == 0.0)))
    nnz = int(jnp.sum(matrix != 0.0))
    k = int(nnz * drop_ratio)
    n_dropped = int(jnp.sum((matrix != 0.0) & (out == 0.0)))
    assert n_dropped >= k > 0, (n_dropped, k)
    print("KERNEL_OK")
</pallas_src>

<mosaic_0001>
module attributes {stable_mosaic.version = 11 : i64} {
  func.func @_keys_kernel(%arg0: i32, %arg1: memref<1xf32, #tpu.memory_space<smem>>, %arg2: memref<1xf32, #tpu.memory_space<smem>>, %arg3: memref<1xi32, #tpu.memory_space<smem>>, %arg4: memref<128x128xf32, #tpu.memory_space<vmem>>, %arg5: memref<128x128xf32, #tpu.memory_space<vmem>>, %arg6: memref<1x1xi32, #tpu.memory_space<smem>>) attributes {dimension_semantics = [#tpu.dimension_semantics<parallel>], iteration_bounds = array<i64: 1>, scalar_prefetch = 0 : i64, scratch_operands = 0 : i64, tpu.core_type = #tpu.core_type<tc>, window_params = [{transform_indices = @transform_0, window_bounds = array<i64: 1>}, {transform_indices = @transform_1, window_bounds = array<i64: 1>}, {transform_indices = @transform_2, window_bounds = array<i64: 1>}, {transform_indices = @transform_3, window_bounds = array<i64: 128, 128>}, {transform_indices = @transform_4, window_bounds = array<i64: 128, 128>}, {transform_indices = @transform_5, window_bounds = array<i64: 1, 1>}]} {
    %c0 = arith.constant 0 : index
    %c0_0 = arith.constant 0 : index
    %0 = vector.load %arg4[%c0, %c0_0] : memref<128x128xf32, #tpu.memory_space<vmem>>, vector<128x128xf32>
    %c128_i32 = arith.constant 128 : i32
    %1 = arith.muli %arg0, %c128_i32 : i32
    %c0_1 = arith.constant 0 : index
    %2 = memref.load %arg1[%c0_1] : memref<1xf32, #tpu.memory_space<smem>>
    %c0_2 = arith.constant 0 : index
    %3 = memref.load %arg2[%c0_2] : memref<1xf32, #tpu.memory_space<smem>>
    %c0_3 = arith.constant 0 : index
    %4 = memref.load %arg3[%c0_3] : memref<1xi32, #tpu.memory_space<smem>>
    %5 = tpu.iota {dimensions = array<i32: 0>} : vector<128x128xi32>
    %6 = vector.broadcast %1 : i32 to vector<128x128xi32>
    %7 = arith.addi %5, %6 : vector<128x128xi32>
    %8 = tpu.iota {dimensions = array<i32: 1>} : vector<128x128xi32>
    %c128_i32_4 = arith.constant 128 : i32
    %9 = vector.broadcast %c128_i32_4 : i32 to vector<128x128xi32>
    %10 = arith.muli %7, %9 : vector<128x128xi32>
    %11 = arith.addi %10, %8 : vector<128x128xi32>
    %c-1640531535_i32 = arith.constant -1640531535 : i32
    %12 = arith.muli %4, %c-1640531535_i32 : i32
    %13 = vector.broadcast %12 : i32 to vector<128x128xi32>
    %14 = arith.addi %11, %13 : vector<128x128xi32>
    %c16_i32 = arith.constant 16 : i32
    %15 = vector.broadcast %c16_i32 : i32 to vector<128x128xi32>
    %16 = arith.shrui %14, %15 : vector<128x128xi32>
    %17 = arith.xori %14, %16 : vector<128x128xi32>
    %c569420461_i32 = arith.constant 569420461 : i32
    %18 = vector.broadcast %c569420461_i32 : i32 to vector<128x128xi32>
    %19 = arith.muli %17, %18 : vector<128x128xi32>
    %c15_i32 = arith.constant 15 : i32
    %20 = vector.broadcast %c15_i32 : i32 to vector<128x128xi32>
    %21 = arith.shrui %19, %20 : vector<128x128xi32>
    %22 = arith.xori %19, %21 : vector<128x128xi32>
    %c1935289751_i32 = arith.constant 1935289751 : i32
    %23 = vector.broadcast %c1935289751_i32 : i32 to vector<128x128xi32>
    %24 = arith.muli %22, %23 : vector<128x128xi32>
    %c15_i32_5 = arith.constant 15 : i32
    %25 = vector.broadcast %c15_i32_5 : i32 to vector<128x128xi32>
    %26 = arith.shrui %24, %25 : vector<128x128xi32>
    %27 = arith.xori %24, %26 : vector<128x128xi32>
    %c9_i32 = arith.constant 9 : i32
    %28 = vector.broadcast %c9_i32 : i32 to vector<128x128xi32>
    %29 = arith.shrui %27, %28 : vector<128x128xi32>
    %30 = arith.sitofp %29 : vector<128x128xi32> to vector<128x128xf32>
    %cst = arith.constant 5.000000e-01 : f32
    %31 = vector.broadcast %cst : f32 to vector<128x128xf32>
    %32 = arith.addf %30, %31 : vector<128x128xf32>
    %cst_6 = arith.constant 1.1920929E-7 : f32
    %33 = vector.broadcast %cst_6 : f32 to vector<128x128xf32>
    %34 = arith.mulf %32, %33 : vector<128x128xf32>
    %cst_7 = arith.constant 0.000000e+00 : f32
    %35 = arith.subf %cst_7, %2 : f32
    %cst_8 = arith.constant 1.000000e+00 : f32
    %36 = vector.broadcast %cst_8 : f32 to vector<128x128xf32>
    %37 = arith.subf %36, %0 : vector<128x128xf32>
    %38 = vector.broadcast %35 : f32 to vector<128x128xf32>
    %39 = arith.mulf %38, %37 : vector<128x128xf32>
    %40 = vector.broadcast %3 : f32 to vector<128x128xf32>
    %41 = arith.mulf %40, %0 : vector<128x128xf32>
    %42 = arith.addf %39, %41 : vector<128x128xf32>
    %43 = math.exp %42 : vector<128x128xf32>
    %cst_9 = arith.constant 1.000000e+00 : f32
    %44 = vector.broadcast %cst_9 : f32 to vector<128x128xf32>
    %45 = arith.addf %44, %43 : vector<128x128xf32>
    %46 = math.log %34 : vector<128x128xf32>
    %47 = arith.mulf %46, %45 : vector<128x128xf32>
    %cst_10 = arith.constant 0.000000e+00 : f32
    %48 = vector.broadcast %cst_10 : f32 to vector<128x128xf32>
    %49 = arith.cmpf one, %0, %48 : vector<128x128xf32>
    %cst_11 = arith.constant 0xFF800000 : f32
    %50 = vector.broadcast %cst_11 : f32 to vector<128x128xf32>
    %51 = arith.select %49, %47, %50 : vector<128x128xi1>, vector<128x128xf32>
    %c0_12 = arith.constant 0 : index
    %c0_13 = arith.constant 0 : index
    %52 = vector.load %arg5[%c0_12, %c0_13] : memref<128x128xf32, #tpu.memory_space<vmem>>, vector<128x128xf32>
    tpu.vector_store %arg5[%c0_12, %c0_13], %51 {strides = array<i32>} : memref<128x128xf32, #tpu.memory_space<vmem>>, vector<128x128xf32>,
    %cst_14 = arith.constant 0.000000e+00 : f32
    %53 = vector.broadcast %cst_14 : f32 to vector<128x128xf32>
    %54 = arith.cmpf one, %0, %53 : vector<128x128xf32>
    %55 = arith.extui %54 : vector<128x128xi1> to vector<128x128xi32>
    %56 = vector.shape_cast %55 : vector<128x128xi32> to vector<1x128x128xi32>
    %cst_15 = arith.constant dense<0> : vector<1xi32>
    %57 = vector.multi_reduction <add>, %56, %cst_15 [1, 2] : vector<1x128x128xi32> to vector<1xi32>
    %58 = vector.shape_cast %57 : vector<1xi32> to vector<1x1x1xi32>
    %59 = vector.extract %58[0, 0, 0] : i32 from vector<1x1x1xi32>
    %c0_16 = arith.constant 0 : index
    %c0_17 = arith.constant 0 : index
    %60 = memref.load %arg6[%c0_16, %c0_17] : memref<1x1xi32, #tpu.memory_space<smem>>
    memref.store %59, %arg6[%c0_16, %c0_17] : memref<1x1xi32, #tpu.memory_space<smem>>
    return
  }
  func.func @transform_0(%arg0: i32) -> i32 {
    %c0_i32 = arith.constant 0 : i32
    %c0_i32_0 = arith.constant 0 : i32
    return %c0_i32 : i32
  }
  func.func @transform_1(%arg0: i32) -> i32 {
    %c0_i32 = arith.constant 0 : i32
    %c0_i32_0 = arith.constant 0 : i32
    return %c0_i32 : i32
  }
  func.func @transform_2(%arg0: i32) -> i32 {
    %c0_i32 = arith.constant 0 : i32
    %c0_i32_0 = arith.constant 0 : i32
    return %c0_i32 : i32
  }
  func.func @transform_3(%arg0: i32) -> (i32, i32) {
    %c0_i32 = arith.constant 0 : i32
    %c0_i32_0 = arith.constant 0 : i32
    return %arg0, %c0_i32 : i32, i32
  }
  func.func @transform_4(%arg0: i32) -> (i32, i32) {
    %c0_i32 = arith.constant 0 : i32
    %c0_i32_0 = arith.constant 0 : i32
    return %arg0, %c0_i32 : i32, i32
  }
  func.func @transform_5(%arg0: i32) -> (i32, i32) {
    %c0_i32 = arith.constant 0 : i32
    %c0_i32_0 = arith.constant 0 : i32
    return %arg0, %c0_i32 : i32, i32
  }
}

module attributes {stable_mosaic.version = 11 : i64} {
  func.func @_drop_kernel(%arg0: i32, %arg1: memref<1xf32, #tpu.memory_space<smem>>, %arg2: memref<1xf32, #tpu.memory_space<smem>>, %arg3: memref<1xi32, #tpu.memory_space<smem>>, %arg4: memref<1xf32, #tpu.memory_space<smem>>, %arg5: memref<128x128xf32, #tpu.memory_space<vmem>>, %arg6: memref<128x128xf32, #tpu.memory_space<vmem>>) attributes {dimension_semantics = [#tpu.dimension_semantics<parallel>], iteration_bounds = array<i64: 1>, scalar_prefetch = 0 : i64, scratch_operands = 0 : i64, tpu.core_type = #tpu.core_type<tc>, window_params = [{transform_indices = @transform_0, window_bounds = array<i64: 1>}, {transform_indices = @transform_1, window_bounds = array<i64: 1>}, {transform_indices = @transform_2, window_bounds = array<i64: 1>}, {transform_indices = @transform_3, window_bounds = array<i64: 1>}, {transform_indices = @transform_4, window_bounds = array<i64: 128, 128>}, {transform_indices = @transform_5, window_bounds = array<i64: 128, 128>}]} {
    %c0 = arith.constant 0 : index
    %c0_0 = arith.constant 0 : index
    %0 = vector.load %arg5[%c0, %c0_0] : memref<128x128xf32, #tpu.memory_space<vmem>>, vector<128x128xf32>
    %c128_i32 = arith.constant 128 : i32
    %1 = arith.muli %arg0, %c128_i32 : i32
    %c0_1 = arith.constant 0 : index
    %2 = memref.load %arg1[%c0_1] : memref<1xf32, #tpu.memory_space<smem>>
    %c0_2 = arith.constant 0 : index
    %3 = memref.load %arg2[%c0_2] : memref<1xf32, #tpu.memory_space<smem>>
    %c0_3 = arith.constant 0 : index
    %4 = memref.load %arg3[%c0_3] : memref<1xi32, #tpu.memory_space<smem>>
    %5 = tpu.iota {dimensions = array<i32: 0>} : vector<128x128xi32>
    %6 = vector.broadcast %1 : i32 to vector<128x128xi32>
    %7 = arith.addi %5, %6 : vector<128x128xi32>
    %8 = tpu.iota {dimensions = array<i32: 1>} : vector<128x128xi32>
    %c128_i32_4 = arith.constant 128 : i32
    %9 = vector.broadcast %c128_i32_4 : i32 to vector<128x128xi32>
    %10 = arith.muli %7, %9 : vector<128x128xi32>
    %11 = arith.addi %10, %8 : vector<128x128xi32>
    %c-1640531535_i32 = arith.constant -1640531535 : i32
    %12 = arith.muli %4, %c-1640531535_i32 : i32
    %13 = vector.broadcast %12 : i32 to vector<128x128xi32>
    %14 = arith.addi %11, %13 : vector<128x128xi32>
    %c16_i32 = arith.constant 16 : i32
    %15 = vector.broadcast %c16_i32 : i32 to vector<128x128xi32>
    %16 = arith.shrui %14, %15 : vector<128x128xi32>
    %17 = arith.xori %14, %16 : vector<128x128xi32>
    %c569420461_i32 = arith.constant 569420461 : i32
    %18 = vector.broadcast %c569420461_i32 : i32 to vector<128x128xi32>
    %19 = arith.muli %17, %18 : vector<128x128xi32>
    %c15_i32 = arith.constant 15 : i32
    %20 = vector.broadcast %c15_i32 : i32 to vector<128x128xi32>
    %21 = arith.shrui %19, %20 : vector<128x128xi32>
    %22 = arith.xori %19, %21 : vector<128x128xi32>
    %c1935289751_i32 = arith.constant 1935289751 : i32
    %23 = vector.broadcast %c1935289751_i32 : i32 to vector<128x128xi32>
    %24 = arith.muli %22, %23 : vector<128x128xi32>
    %c15_i32_5 = arith.constant 15 : i32
    %25 = vector.broadcast %c15_i32_5 : i32 to vector<128x128xi32>
    %26 = arith.shrui %24, %25 : vector<128x128xi32>
    %27 = arith.xori %24, %26 : vector<128x128xi32>
    %c9_i32 = arith.constant 9 : i32
    %28 = vector.broadcast %c9_i32 : i32 to vector<128x128xi32>
    %29 = arith.shrui %27, %28 : vector<128x128xi32>
    %30 = arith.sitofp %29 : vector<128x128xi32> to vector<128x128xf32>
    %cst = arith.constant 5.000000e-01 : f32
    %31 = vector.broadcast %cst : f32 to vector<128x128xf32>
    %32 = arith.addf %30, %31 : vector<128x128xf32>
    %cst_6 = arith.constant 1.1920929E-7 : f32
    %33 = vector.broadcast %cst_6 : f32 to vector<128x128xf32>
    %34 = arith.mulf %32, %33 : vector<128x128xf32>
    %cst_7 = arith.constant 0.000000e+00 : f32
    %35 = arith.subf %cst_7, %2 : f32
    %cst_8 = arith.constant 1.000000e+00 : f32
    %36 = vector.broadcast %cst_8 : f32 to vector<128x128xf32>
    %37 = arith.subf %36, %0 : vector<128x128xf32>
    %38 = vector.broadcast %35 : f32 to vector<128x128xf32>
    %39 = arith.mulf %38, %37 : vector<128x128xf32>
    %40 = vector.broadcast %3 : f32 to vector<128x128xf32>
    %41 = arith.mulf %40, %0 : vector<128x128xf32>
    %42 = arith.addf %39, %41 : vector<128x128xf32>
    %43 = math.exp %42 : vector<128x128xf32>
    %cst_9 = arith.constant 1.000000e+00 : f32
    %44 = vector.broadcast %cst_9 : f32 to vector<128x128xf32>
    %45 = arith.addf %44, %43 : vector<128x128xf32>
    %46 = math.log %34 : vector<128x128xf32>
    %47 = arith.mulf %46, %45 : vector<128x128xf32>
    %cst_10 = arith.constant 0.000000e+00 : f32
    %48 = vector.broadcast %cst_10 : f32 to vector<128x128xf32>
    %49 = arith.cmpf one, %0, %48 : vector<128x128xf32>
    %cst_11 = arith.constant 0xFF800000 : f32
    %50 = vector.broadcast %cst_11 : f32 to vector<128x128xf32>
    %51 = arith.select %49, %47, %50 : vector<128x128xi1>, vector<128x128xf32>
    %c0_12 = arith.constant 0 : index
    %52 = memref.load %arg4[%c0_12] : memref<1xf32, #tpu.memory_space<smem>>
    %53 = vector.broadcast %52 : f32 to vector<128x128xf32>
    %54 = arith.cmpf oge, %51, %53 : vector<128x128xf32>
    %cst_13 = arith.constant 0.000000e+00 : f32
    %55 = vector.broadcast %cst_13 : f32 to vector<128x128xf32>
    %56 = arith.select %54, %55, %0 : vector<128x128xi1>, vector<128x128xf32>
    %c0_14 = arith.constant 0 : index
    %c0_15 = arith.constant 0 : index
    %57 = vector.load %arg6[%c0_14, %c0_15] : memref<128x128xf32, #tpu.memory_space<vmem>>, vector<128x128xf32>
    tpu.vector_store %arg6[%c0_14, %c0_15], %56 {strides = array<i32>} : memref<128x128xf32, #tpu.memory_space<vmem>>, vector<128x128xf32>,
    return
  }
  func.func @transform_0(%arg0: i32) -> i32 {
    %c0_i32 = arith.constant 0 : i32
    %c0_i32_0 = arith.constant 0 : i32
    return %c0_i32 : i32
  }
  func.func @transform_1(%arg0: i32) -> i32 {
    %c0_i32 = arith.constant 0 : i32
    %c0_i32_0 = arith.constant 0 : i32
    return %c0_i32 : i32
  }
  func.func @transform_2(%arg0: i32) -> i32 {
    %c0_i32 = arith.constant 0 : i32
    %c0_i32_0 = arith.constant 0 : i32
    return %c0_i32 : i32
  }
  func.func @transform_3(%arg0: i32) -> i32 {
    %c0_i32 = arith.constant 0 : i32
    %c0_i32_0 = arith.constant 0 : i32
    return %c0_i32 : i32
  }
  func.func @transform_4(%arg0: i32) -> (i32, i32) {
    %c0_i32 = arith.constant 0 : i32
    %c0_i32_0 = arith.constant 0 : i32
    return %arg0, %c0_i32 : i32, i32
  }
  func.func @transform_5(%arg0: i32) -> (i32, i32) {
    %c0_i32 = arith.constant 0 : i32
    %c0_i32_0 = arith.constant 0 : i32
    return %arg0, %c0_i32 : i32, i32
  }
}

</mosaic_0001>

<bundles_post_ra>
// kernel: adaptive_edge_dropping.2
= control target key start
LH: loop header
LB: loop body
LE: loop exit
PB: predicated region body
PF: predicated region fallthrough
CT: control target
= control target key end

     0   :  { %v681_v16 = vmov 0   ;;  %s1121_s0 = inlined_call_operand.<no memory space> [shape: f32[1], index: 0, kind: input, shape index: {}]   ;;  %s1122_s1 = inlined_call_operand.<no memory space> [shape: f32[1], index: 1, kind: input, shape index: {}]   ;;  %s1123_s2 = inlined_call_operand.<no memory space> [shape: s32[1], index: 2, kind: input, shape index: {}]   ;;  %s1124_s3 = inlined_call_operand.vmem [shape: f32[128,128], index: 3, kind: input, shape index: {}]   ;;  %s1125_s4 = inlined_call_operand.vmem [shape: f32[128,128], index: 4, kind: output, shape index: {0}]   ;;  %s1126_s5 = inlined_call_operand.hbm [shape: s32[1,1], index: 5, kind: output, shape index: {1}]  }
   0x1   :  { %v716_v0 = vld [vmem:[%s1124_s3] sm:$0xff]  ;;  %v721_v1 = vld [vmem:[%s1124_s3 + $0x8] sm:$0xff]  ;;  %v726_v2 = vld [vmem:[%s1124_s3 + $0x10] sm:$0xff] }
   0x2   :  { %v731_v3 = vld [vmem:[%s1124_s3 + $0x18] sm:$0xff]  ;;  %v736_v4 = vld [vmem:[%s1124_s3 + $0x20] sm:$0xff]  ;;  %v741_v5 = vld [vmem:[%s1124_s3 + $0x28] sm:$0xff]  ;;  %vm484_vm0 = vcmp.ne.f32.partialorder %v716_v0, 0.0  ;;  %vm485_vm1 = vcmp.ne.f32.partialorder %v721_v1, 0.0  ;;  %vm486_vm2 = vcmp.ne.f32.partialorder %v726_v2, 0.0 }
   0x3   :  { %1136 = vst [vmem:[#allocation8_spill] sm:$0xff] %v741_v5  ;;  %v746_v6 = vld [vmem:[%s1124_s3 + $0x30] sm:$0xff]  ;;  %v751_v7 = vld [vmem:[%s1124_s3 + $0x38] sm:$0xff]  ;;  %v756_v8 = vld [vmem:[%s1124_s3 + $0x40] sm:$0xff]  ;;  %vm487_vm3 = vcmp.ne.f32.partialorder %v731_v3, 0.0  ;;  %vm488_vm4 = vcmp.ne.f32.partialorder %v736_v4, 0.0 }
   0x4   :  { %1137 = vst [vmem:[#allocation9_spill] sm:$0xff] %v746_v6  ;;  %1138 = vst [vmem:[#allocation10_spill] sm:$0xff] %v751_v7  ;;  %v763_v9 = vld [vmem:[%s1124_s3 + $0x48] sm:$0xff]  ;;  %v768_v10 = vld [vmem:[%s1124_s3 + $0x50] sm:$0xff]  ;;  %vm489_vm5 = vcmp.ne.f32.partialorder %v741_v5, 0.0  ;;  %vm490_vm6 = vcmp.ne.f32.partialorder %v746_v6, 0.0 }
   0x5   :  { %v773_v11 = vld [vmem:[%s1124_s3 + $0x58] sm:$0xff]  ;;  %v781_v12 = vld [vmem:[%s1124_s3 + $0x60] sm:$0xff]  ;;  %vm491_vm7 = vcmp.ne.f32.partialorder %v751_v7, 0.0  ;;  %vm492_vm8 = vcmp.ne.f32.partialorder %v756_v8, 0.0  ;;  %v790_v13 = vld [vmem:[%s1124_s3 + $0x68] sm:$0xff]  ;;  %vm493_vm9 = vcmp.ne.f32.partialorder %v763_v9, 0.0 }
   0x6   :  { %1139 = vst [vmem:[#allocation11_spill] sm:$0xff] %v790_v13  ;;  %v795_v14 = vld [vmem:[%s1124_s3 + $0x70] sm:$0xff]  ;;  %v800_v15 = vld [vmem:[%s1124_s3 + $0x78] sm:$0xff]  ;;  %vm494_vm10 = vcmp.ne.f32.partialorder %v768_v10, 0.0  ;;  %vm495_vm11 = vcmp.ne.f32.partialorder %v773_v11, 0.0  ;;  %v532_v17 = vsel %vm484_vm0, 1, %v681_v16 }
   0x7   :  { %1140 = vst [vmem:[#allocation12_spill] sm:$0xff] %v795_v14  ;;  %1141 = vst [vmem:[#allocation13_spill] sm:$0xff] %v800_v15  ;;  %v533_v18 = vsel %vm485_vm1, 1, %v681_v16  ;;  %v534_v19 = vsel %vm486_vm2, 1, %v681_v16  ;;  %v535_v20 = vsel %vm487_vm3, 1, %v681_v16 }
   0x8   :  { %14 = vsyncpa [#allocation6], 0  ;;  %v536_v21 = vsel %vm488_vm4, 1, %v681_v16  ;;  %v537_v22 = vsel %vm489_vm5, 1, %v681_v16  ;;  %v538_v23 = vsel %vm490_vm6, 1, %v681_v16  ;;  %v539_v24 = vsel %vm491_vm7, 1, %v681_v16 }
   0x9   :  { %vm496_vm12 = vcmp.ne.f32.partialorder %v781_v12, 0.0  ;;  %vm497_vm13 = vcmp.ne.f32.partialorder %v790_v13, 0.0  ;;  %vm498_vm14 = vcmp.ne.f32.partialorder %v795_v14, 0.0  ;;  %vm499_vm15 = vcmp.ne.f32.partialorder %v800_v15, 0.0  ;;  %s111_s26 = smul.u32 2654435761, %s1123_s2 }
   0xa   :  { %v540_v25 = vsel %vm492_vm8, 1, %v681_v16  ;;  %v541_v26 = vsel %vm493_vm9, 1, %v681_v16  ;;  %v542_v27 = vsel %vm494_vm10, 1, %v681_v16  ;;  %v543_v28 = vsel %vm495_vm11, 1, %v681_v16  ;;  %s321_s28 = ssub.f32 0.0, %s1121_s0  ;;  %s669_s10 = scalar_lea.hbm %s1126_s5, 16 }
   0xb   :  { %v548_v29 = vadd.s32 %v536_v21, %v532_v17  ;;  %v549_v30 = vadd.s32 %v537_v22, %v533_v18  ;;  %v550_v31 = vadd.s32 %v538_v23, %v534_v19  ;;  %v551_v32 = vadd.s32 %v539_v24, %v535_v20  ;;  %p670_p0 = scmp.ne.s32.totalorder %s1126_s5, %s669_s10  ;;  %p673_p1 = scmp.lt.u32.totalorder %s669_s10, %s1126_s5 }
   0xc   :  { %v544_v33 = vsel %vm496_vm12, 1, %v681_v16  ;;  %v545_v34 = vsel %vm497_vm13, 1, %v681_v16  ;;  %v546_v35 = vsel %vm498_vm14, 1, %v681_v16  ;;  %v547_v36 = vsel %vm499_vm15, 1, %v681_v16 }
   0xd   :  { %v552_v37 = vadd.s32 %v548_v29, %v540_v25  ;;  %v553_v38 = vadd.s32 %v549_v30, %v541_v26  ;;  %v554_v39 = vadd.s32 %v550_v31, %v542_v27  ;;  %v555_v40 = vadd.s32 %v551_v32, %v543_v28  ;;  %p675_p2 = pnand %p673_p1, %p670_p0 }
   0xe   :  { %v43_v52 = vlaneseq  ;;  %v852_v62 = vstv %s111_s26 }
   0xf   :  { %v556_v41 = vadd.s32 %v552_v37, %v544_v33  ;;  %v557_v42 = vadd.s32 %v553_v38, %v545_v34  ;;  %v558_v43 = vadd.s32 %v554_v39, %v546_v35  ;;  %v559_v44 = vadd.s32 %v555_v40, %v547_v36 }
  0x10   :  { %v44_v53 = vshrl.u32 %v43_v52, 7  ;;  %v850_v61 = vand.u32 127, %v43_v52 }
  0x11   :  { %v560_v45 = vadd.s32 %v557_v42, %v556_v41  ;;  %v561_v46 = vadd.s32 %v559_v44, %v558_v43 }
  0x12   :  { %v45_v60 = vadd.s32 8, %v44_v53  ;;  %v46_v16 = vadd.s32 16, %v44_v53  ;;  %v47_v20 = vadd.s32 24, %v44_v53  ;;  %v48_v21 = vadd.s32 32, %v44_v53 }
  0x13   :  { %v562_v47 = vadd.s32 %v561_v46, %v560_v45  ;;  %v49_v24 = vadd.s32 40, %v44_v53  ;;  %v50_v25 = vadd.s32 48, %v44_v53  ;;  %v51_v26 = vadd.s32 56, %v44_v53 }
  0x14   :  { %v52_v27 = vadd.s32 64, %v44_v53  ;;  %v53_v28 = vadd.s32 72, %v44_v53  ;;  %v54_v29 = vadd.s32 80, %v44_v53  ;;  %v79_v30 = vmul.u32 128, %v44_v53 }
  0x15   :  { %v564_v48 = vshrl.u32 %v562_v47, 16  ;;  %v563_v49 = vand.u32 65535, %v562_v47  ;;  %v80_v31 = vmul.u32 128, %v45_v60  ;;  %v55_v32 = vadd.s32 88, %v44_v53 }
  0x16   :  { %v56_v33 = vadd.s32 96, %v44_v53  ;;  %v57_v34 = vadd.s32 104, %v44_v53  ;;  %v81_v35 = vmul.u32 128, %v46_v16  ;;  %v58_v36 = vadd.s32 112, %v44_v53 }
  0x17   :  { %v566_v50 = vcvt.s32.f32 %v564_v48  ;;  %v565_v51 = vcvt.s32.f32 %v563_v49  ;;  %v59_v37 = vadd.s32 120, %v44_v53  ;;  %v82_v38 = vmul.u32 128, %v47_v20 }
  0x18   :  { %v83_v39 = vmul.u32 128, %v48_v21  ;;  %v84_v40 = vmul.u32 128, %v49_v24  ;;  %v95_v46 = vadd.s32 %v79_v30, %v850_v61  ;;  %v96_v47 = vadd.s32 %v80_v31, %v850_v61 }
  0x19   :  { %569 = vadd.xlane.f32.xlu0 %v566_v50  ;;  %v85_v41 = vmul.u32 128, %v50_v25  ;;  %v86_v44 = vmul.u32 128, %v51_v26  ;;  %v97_v50 = vadd.s32 %v81_v35, %v850_v61  ;;  %v98_v60 = vadd.s32 %v82_v38, %v850_v61 }
  0x1a   :  { %v87_v45 = vmul.u32 128, %v52_v27  ;;  %v88_v48 = vmul.u32 128, %v53_v28  ;;  %v99_v16 = vadd.s32 %v83_v39, %v850_v61  ;;  %v100_v24 = vadd.s32 %v84_v40, %v850_v61 }
  0x1b   :  { %v89_v49 = vmul.u32 128, %v54_v29  ;;  %v90_v52 = vmul.u32 128, %v55_v32  ;;  %v101_v25 = vadd.s32 %v85_v41, %v850_v61  ;;  %v102_v26 = vadd.s32 %v86_v44, %v850_v61 }
  0x1c   :  { %v91_v53 = vmul.u32 128, %v56_v33  ;;  %v92_v20 = vmul.u32 128, %v57_v34  ;;  %v103_v27 = vadd.s32 %v87_v45, %v850_v61  ;;  %v113_v28 = vadd.s32 %v852_v62, %v95_v46 }
  0x1d   :  { %567 = vadd.xlane.f32.xlu0 %v565_v51  ;;  %v93_v21 = vmul.u32 128, %v58_v36  ;;  %v114_v29 = vadd.s32 %v852_v62, %v96_v47  ;;  %v94_v30 = vmul.u32 128, %v59_v37  ;;  %v104_v31 = vadd.s32 %v88_v48, %v850_v61 }
  0x1e   :  { %v105_v32 = vadd.s32 %v89_v49, %v850_v61  ;;  %v115_v33 = vadd.s32 %v852_v62, %v97_v50  ;;  %v106_v34 = vadd.s32 %v90_v52, %v850_v61  ;;  %v107_v35 = vadd.s32 %v91_v53, %v850_v61 }
  0x1f   :  { %v116_v36 = vadd.s32 %v852_v62, %v98_v60  ;;  %v117_v38 = vadd.s32 %v852_v62, %v99_v16  ;;  %v108_v39 = vadd.s32 %v92_v20, %v850_v61  ;;  %v109_v40 = vadd.s32 %v93_v21, %v850_v61 }
  0x20   :  { %v118_v37 = vadd.s32 %v852_v62, %v100_v24  ;;  %v119_v41 = vadd.s32 %v852_v62, %v101_v25  ;;  %v120_v44 = vadd.s32 %v852_v62, %v102_v26  ;;  %v121_v45 = vadd.s32 %v852_v62, %v103_v27 }
  0x21   :  { %v129_v46 = vshrl.u32 %v113_v28, 16  ;;  %v130_v47 = vshrl.u32 %v114_v29, 16  ;;  %v110_v48 = vadd.s32 %v94_v30, %v850_v61  ;;  %v122_v49 = vadd.s32 %v852_v62, %v104_v31 }
  0x22   :  { %v123_v50 = vadd.s32 %v852_v62, %v105_v32  ;;  %v131_v52 = vshrl.u32 %v115_v33, 16  ;;  %v124_v53 = vadd.s32 %v852_v62, %v106_v34  ;;  %v125_v60 = vadd.s32 %v852_v62, %v107_v35 }
  0x23   :  { %v132_v16 = vshrl.u32 %v116_v36, 16  ;;  %v133_v20 = vshrl.u32 %v117_v38, 16  ;;  %v126_v21 = vadd.s32 %v852_v62, %v108_v39  ;;  %v127_v24 = vadd.s32 %v852_v62, %v109_v40 }
  0x24   :  { %v134_v25 = vshrl.u32 %v118_v37, 16  ;;  %v135_v26 = vshrl.u32 %v119_v41, 16  ;;  %v136_v27 = vshrl.u32 %v120_v44, 16  ;;  %v137_v51 = vshrl.u32 %v121_v45, 16 }
  0x25   :  { %v145_v61 = vxor.u32 %v129_v46, %v113_v28  ;;  %v146_v30 = vxor.u32 %v130_v47, %v114_v29  ;;  %v128_v31 = vadd.s32 %v852_v62, %v110_v48  ;;  %v138_v32 = vshrl.u32 %v122_v49, 16 }
  0x26   :  { %v139_v43 = vshrl.u32 %v123_v50, 16  ;;  %v147_v42 = vxor.u32 %v131_v52, %v115_v33  ;;  %v140_v34 = vshrl.u32 %v124_v53, 16  ;;  %v141_v23 = vshrl.u32 %v125_v60, 16 }
  0x27   :  { %v148_v35 = vxor.u32 %v132_v16, %v116_v36  ;;  %v149_v22 = vxor.u32 %v133_v20, %v117_v38  ;;  %v142_v19 = vshrl.u32 %v126_v21, 16  ;;  %v143_v18 = vshrl.u32 %v127_v24, 16 }
  0x28   :  { %v150_v39 = vxor.u32 %v134_v25, %v118_v37  ;;  %v151_v17 = vxor.u32 %v135_v26, %v119_v41  ;;  %v152_v40 = vxor.u32 %v136_v27, %v120_v44  ;;  %v153_v63 = vxor.u32 %v137_v51, %v121_v45 }
  0x29   :  { %v161_v59 = vmul.u32 569420461, %v145_v61  ;;  %v162_v58 = vmul.u32 569420461, %v146_v30  ;;  %v144_v57 = vshrl.u32 %v128_v31, 16  ;;  %v154_v28 = vxor.u32 %v138_v32, %v122_v49 }
  0x2a   :  { %v155_v29 = vxor.u32 %v139_v43, %v123_v50  ;;  %v163_v46 = vmul.u32 569420461, %v147_v42  ;;  %v156_v62 = vxor.u32 %v140_v34, %v124_v53  ;;  %v157_v47 = vxor.u32 %v141_v23, %v125_v60 }
  0x2b   :  { %v164_v48 = vmul.u32 569420461, %v148_v35  ;;  %v165_v33 = vmul.u32 569420461, %v149_v22  ;;  %v158_v36 = vxor.u32 %v142_v19, %v126_v21  ;;  %v159_v38 = vxor.u32 %v143_v18, %v127_v24 }
  0x2c   :  { %v166_v37 = vmul.u32 569420461, %v150_v39  ;;  %v167_v41 = vmul.u32 569420461, %v151_v17  ;;  %v177_v45 = vshrl.u32 %v161_v59, 15  ;;  %v178_v52 = vshrl.u32 %v162_v58, 15 }
  0x2d   :  { %v168_v44 = vmul.u32 569420461, %v152_v40  ;;  %v169_v51 = vmul.u32 569420461, %v153_v63  ;;  %v160_v16 = vxor.u32 %v144_v57, %v128_v31  ;;  %v179_v42 = vshrl.u32 %v163_v46, 15 }
  0x2e   :  { %v170_v49 = vmul.u32 569420461, %v154_v28  ;;  %v171_v43 = vmul.u32 569420461, %v155_v29  ;;  %v899_v53 = vstv %s321_s28  ;;  %v180_v19 = vshrl.u32 %v164_v48, 15 }
  0x2f   :  { %v172_v50 = vmul.u32 569420461, %v156_v62  ;;  %v173_v23 = vmul.u32 569420461, %v157_v47  ;;  %v181_v18 = vshrl.u32 %v165_v33, 15  ;;  %v182_v21 = vshrl.u32 %v166_v37, 15 }
  0x30   :  { %v174_v60 = vmul.u32 569420461, %v158_v36  ;;  %v175_v20 = vmul.u32 569420461, %v159_v38  ;;  %v183_v17 = vshrl.u32 %v167_v41, 15  ;;  %v193_v24 = vxor.u32 %v177_v45, %v161_v59 }
  0x31   :  { %v194_v63 = vxor.u32 %v178_v52, %v162_v58  ;;  %v176_v25 = vmul.u32 569420461, %v160_v16  ;;  %v184_v26 = vshrl.u32 %v168_v44, 15  ;;  %v185_v57 = vshrl.u32 %v169_v51, 15 }
  0x32   :  { %v195_v27 = vxor.u32 %v179_v42, %v163_v46  ;;  %v186_v61 = vshrl.u32 %v170_v49, 15  ;;  %v187_v30 = vshrl.u32 %v171_v43, 15  ;;  %v188_v31 = vshrl.u32 %v172_v50, 15 }
  0x33   :  { %v189_v32 = vshrl.u32 %v173_v23, 15  ;;  %v190_v34 = vshrl.u32 %v174_v60, 15  ;;  %v191_v35 = vshrl.u32 %v175_v20, 15  ;;  %v196_v39 = vxor.u32 %v180_v19, %v164_v48 }
  0x34   :  { %v197_v40 = vxor.u32 %v181_v18, %v165_v33  ;;  %v198_v28 = vxor.u32 %v182_v21, %v166_v37  ;;  %v199_v29 = vxor.u32 %v183_v17, %v167_v41  ;;  %v209_v62 = vmul.u32 1935289751, %v193_v24 }
  0x35   :  { %v210_v47 = vmul.u32 1935289751, %v194_v63  ;;  %v192_v36 = vshrl.u32 %v176_v25, 15  ;;  %v200_v38 = vxor.u32 %v184_v26, %v168_v44  ;;  %v201_v59 = vxor.u32 %v185_v57, %v169_v51 }
  0x36   :  { %v211_v58 = vmul.u32 1935289751, %v195_v27  ;;  %v202_v45 = vxor.u32 %v186_v61, %v170_v49  ;;  %v203_v52 = vxor.u32 %v187_v30, %v171_v43  ;;  %v204_v16 = vxor.u32 %v188_v31, %v172_v50 }
  0x37   :  { %v205_v46 = vxor.u32 %v189_v32, %v173_v23  ;;  %v206_v42 = vxor.u32 %v190_v34, %v174_v60  ;;  %v207_v22 = vxor.u32 %v191_v35, %v175_v20  ;;  %v212_v56 = vmul.u32 1935289751, %v196_v39 }
  0x38   :  { %v213_v55 = vmul.u32 1935289751, %v197_v40  ;;  %v214_v54 = vmul.u32 1935289751, %v198_v28  ;;  %v225_v48 = vshrl.u32 %v209_v62, 15  ;;  %v226_v33 = vshrl.u32 %v210_v47, 15 }
  0x39   :  { %v215_v15 = vmul.u32 1935289751, %v199_v29  ;;  %v208_v37 = vxor.u32 %v192_v36, %v176_v25  ;;  %v216_v41 = vmul.u32 1935289751, %v200_v38  ;;  %v227_v18 = vshrl.u32 %v211_v58, 15 }
  0x3a   :  { %v217_v19 = vmul.u32 1935289751, %v201_v59  ;;  %v218_v21 = vmul.u32 1935289751, %v202_v45  ;;  %v1142_v51 = vsub.f32 1.0, %v716_v0  ;;  %v1143_v43 = vsub.f32 1.0, %v721_v1 }
  0x3b   :  { %v219_v44 = vmul.u32 1935289751, %v203_v52  ;;  %v220_v23 = vmul.u32 1935289751, %v204_v16  ;;  %v1144_v20 = vsub.f32 1.0, %v726_v2  ;;  %v1145_v24 = vsub.f32 1.0, %v731_v3 }
  0x3c   :  { %v904_v49 = vmul.f32 %v899_v53, %v1142_v51  ;;  %v909_v50 = vmul.f32 %v899_v53, %v1143_v43  ;;  %v221_v60 = vmul.u32 1935289751, %v205_v46  ;;  %v222_v25 = vmul.u32 1935289751, %v206_v42 }
  0x3d   :  { %v914_v17 = vmul.f32 %v899_v53, %v1144_v20  ;;  %v919_v63 = vmul.f32 %v899_v53, %v1145_v24  ;;  %v223_v26 = vmul.u32 1935289751, %v207_v22  ;;  %v241_v57 = vxor.u32 %v225_v48, %v209_v62 }
  0x3e   :  { %v242_v27 = vxor.u32 %v226_v33, %v210_v47  ;;  %v224_v61 = vmul.u32 1935289751, %v208_v37  ;;  %v228_v30 = vshrl.u32 %v212_v56, 15  ;;  %v229_v31 = vshrl.u32 %v213_v55, 15 }
  0x3f   :  { %1146 = vst [vmem:[#allocation14_spill] sm:$0xff] %v919_v63  ;;  %v243_v32 = vxor.u32 %v227_v18, %v211_v58  ;;  %v230_v34 = vshrl.u32 %v214_v54, 15  ;;  %v231_v35 = vshrl.u32 %v215_v15, 15  ;;  %v232_v39 = vshrl.u32 %v216_v41, 15 }
  0x40   :  { %v233_v40 = vshrl.u32 %v217_v19, 15  ;;  %v234_v28 = vshrl.u32 %v218_v21, 15  ;;  %v235_v29 = vshrl.u32 %v219_v44, 15  ;;  %v236_v36 = vshrl.u32 %v220_v23, 15 }
  0x41   :  { %v237_v38 = vshrl.u32 %v221_v60, 15  ;;  %v238_v59 = vshrl.u32 %v222_v25, 15  ;;  %v239_v45 = vshrl.u32 %v223_v26, 15  ;;  %v257_v52 = vshrl.u32 %v241_v57, 9 }
  0x42   :  { %v258_v16 = vshrl.u32 %v242_v27, 9  ;;  %v240_v46 = vshrl.u32 %v224_v61, 15  ;;  %v244_v22 = vxor.u32 %v228_v30, %v212_v56  ;;  %v245_v62 = vxor.u32 %v229_v31, %v213_v55 }
  0x43   :  { %v259_v47 = vshrl.u32 %v243_v32, 9  ;;  %v246_v42 = vxor.u32 %v230_v34, %v214_v54  ;;  %v247_v48 = vxor.u32 %v231_v35, %v215_v15  ;;  %v248_v33 = vxor.u32 %v232_v39, %v216_v41 }
  0x44   :  { %v249_v58 = vxor.u32 %v233_v40, %v217_v19  ;;  %v250_v37 = vxor.u32 %v234_v28, %v218_v21  ;;  %v251_v18 = vxor.u32 %v235_v29, %v219_v44  ;;  %v252_v51 = vxor.u32 %v236_v36, %v220_v23 }
  0x45   :  { %v253_v43 = vxor.u32 %v237_v38, %v221_v60  ;;  %v254_v20 = vxor.u32 %v238_v59, %v222_v25  ;;  %v921_v24 = vxor.u32 %v239_v45, %v223_v26  ;;  %v273_v63 = vcvt.s32.f32 %v257_v52  ;;  %v1161_v60 = vld [vmem:[#allocation13_spill] sm:$0xff] }
  0x46   :  { %v274_v14 = vcvt.s32.f32 %v258_v16  ;;  %v923_v13 = vxor.u32 %v240_v46, %v224_v61  ;;  %v260_v57 = vshrl.u32 %v244_v22, 9  ;;  %v261_v27 = vshrl.u32 %v245_v62, 9 }
  0x47   :  { %v275_v56 = vcvt.s32.f32 %v259_v47  ;;  %v262_v55 = vshrl.u32 %v246_v42, 9  ;;  %v263_v30 = vshrl.u32 %v247_v48, 9  ;;  %v264_v54 = vshrl.u32 %v248_v33, 9 }
  0x48   :  { %v265_v15 = vshrl.u32 %v249_v58, 9  ;;  %v266_v41 = vshrl.u32 %v250_v37, 9  ;;  %v267_v19 = vshrl.u32 %v251_v18, 9  ;;  %v268_v21 = vshrl.u32 %v252_v51, 9 }
  0x49   :  { %v269_v44 = vshrl.u32 %v253_v43, 9  ;;  %v270_v23 = vshrl.u32 %v254_v20, 9  ;;  %v289_v25 = vadd.f32 0.5, %v273_v63  ;;  %v290_v26 = vadd.f32 0.5, %v274_v14 }
  0x4a   :  { %v927_v61 = vcvt.s32.f32 %v260_v57  ;;  %v929_v32 = vcvt.s32.f32 %v261_v27  ;;  %v291_v34 = vadd.f32 0.5, %v275_v56  ;;  %v931_v35 = vcvt.s32.f32 %v262_v55 }
  0x4b   :  { %v933_v39 = vcvt.s32.f32 %v263_v30  ;;  %v935_v40 = vcvt.s32.f32 %v264_v54  ;;  %v937_v28 = vcvt.s32.f32 %v265_v15  ;;  %v939_v29 = vcvt.s32.f32 %v266_v41 }
  0x4c   :  { %v941_v36 = vcvt.s32.f32 %v267_v19  ;;  %v943_v14 = vcvt.s32.f32 %v268_v21  ;;  %v945_v63 = vcvt.s32.f32 %v269_v44  ;;  %v947_v38 = vcvt.s32.f32 %v270_v23 }
  0x4d   :  { %v305_v59 = vmul.f32 1.1920929e-07, %v289_v25  ;;  %v306_v45 = vmul.f32 1.1920929e-07, %v290_v26  ;;  %v355_v52 = vstv %s1122_s1  ;;  %v307_v16 = vmul.f32 1.1920929e-07, %v291_v34 }
  0x4e   :  { %v356_v46 = vmul.f32 %v355_v52, %v716_v0  ;;  %v357_v22 = vmul.f32 %v355_v52, %v721_v1  ;;  %v358_v62 = vmul.f32 %v355_v52, %v726_v2  ;;  %v1147_v47 = vsub.f32 1.0, %v736_v4 }
  0x4f   :  { %v1148_v48 = vsub.f32 1.0, %v741_v5  ;;  %v1149_v58 = vsub.f32 1.0, %v746_v6  ;;  %v359_v18 = vmul.f32 %v355_v52, %v731_v3  ;;  %v1150_v51 = vsub.f32 1.0, %v751_v7 }
  0x50   :  { %v343_v42 = vmul.f32 %v899_v53, %v1147_v47  ;;  %v1151_v20 = vsub.f32 1.0, %v756_v8  ;;  %v1152_v27 = vsub.f32 1.0, %v763_v9  ;;  %v360_v55 = vmul.f32 %v355_v52, %v736_v4  ;;  %v1156_v47 = vld [vmem:[#allocation11_spill] sm:$0xff] }
  0x51   :  { %v344_v33 = vmul.f32 %v899_v53, %v1148_v48  ;;  %v345_v37 = vmul.f32 %v899_v53, %v1149_v58  ;;  %v346_v43 = vmul.f32 %v899_v53, %v1150_v51  ;;  %v1153_v30 = vsub.f32 1.0, %v768_v10  ;;  %v1158_v51 = vld [vmem:[#allocation12_spill] sm:$0xff] }
  0x52   :  { %v347_v57 = vmul.f32 %v899_v53, %v1151_v20  ;;  %v348_v56 = vmul.f32 %v899_v53, %v1152_v27  ;;  %v1154_v15 = vsub.f32 1.0, %v773_v11  ;;  %v361_v19 = vmul.f32 %v355_v52, %v741_v5 }
  0x53   :  { %v349_v54 = vmul.f32 %v899_v53, %v1153_v30  ;;  %v362_v21 = vmul.f32 %v355_v52, %v746_v6  ;;  %v1155_v44 = vsub.f32 1.0, %v781_v12  ;;  %v372_v25 = vadd.f32 %v356_v46, %v904_v49 }
  0x54   :  { %v350_v41 = vmul.f32 %v899_v53, %v1154_v15  ;;  %v373_v26 = vadd.f32 %v357_v22, %v909_v50  ;;  %v374_v34 = vadd.f32 %v358_v62, %v914_v17  ;;  %v1157_v48 = vsub.f32 1.0, %v1156_v47  ;;  %v1160_v15 = vld [vmem:[#allocation14_spill] sm:$0xff] }
  0x55   :  { %v351_v23 = vmul.f32 %v899_v53, %v1155_v44  ;;  %v1159_v20 = vsub.f32 1.0, %v1158_v51  ;;  %v363_v30 = vmul.f32 %v355_v52, %v751_v7  ;;  %v375_v31 = vadd.f32 %v359_v18, %v1160_v15 }
  0x56   :  { %v352_v58 = vmul.f32 %v899_v53, %v1157_v48  ;;  %v1162_v44 = vsub.f32 1.0, %v1161_v60  ;;  %v364_v50 = vmul.f32 %v355_v52, %v756_v8  ;;  %v376_v46 = vadd.f32 %v360_v55, %v343_v42 }
  0x57   :  { %v353_v27 = vmul.f32 %v899_v53, %v1159_v20  ;;  %605 = vlog2.f32 %v305_v59  ;;  %v365_v17 = vmul.f32 %v355_v52, %v763_v9  ;;  %v366_v22 = vmul.f32 %v355_v52, %v768_v10 }
  0x58   :  { %v354_v49 = vmul.f32 %v899_v53, %v1162_v44  ;;  %v377_v62 = vadd.f32 %v361_v19, %v344_v33  ;;  %v378_v48 = vadd.f32 %v362_v21, %v345_v37  ;;  %v388_v6 = vmul.f32 1.442695, %v372_v25 }
  0x59   :  { %v390_v20 = vmul.f32 1.442695, %v373_v26  ;;  %v392_v5 = vmul.f32 1.442695, %v374_v34  ;;  %607 = vlog2.f32 %v306_v45  ;;  %v367_v18 = vmul.f32 %v355_v52, %v773_v11 }
  0x5a   :  { %v379_v15 = vadd.f32 %v363_v30, %v346_v43  ;;  %v394_v7 = vmul.f32 1.442695, %v375_v31  ;;  %609 = vlog2.f32 %v307_v16  ;;  %v368_v53 = vmul.f32 %v355_v52, %v781_v12 }
  0x5b   :  { %v380_v44 = vadd.f32 %v364_v50, %v347_v57  ;;  %611 = vpow2.f32 %v388_v6  ;;  %v396_v59 = vmul.f32 1.442695, %v376_v46  ;;  %v369_v42 = vmul.f32 %v355_v52, %v1156_v47 }
  0x5c   :  { %v381_v55 = vadd.f32 %v365_v17, %v348_v56  ;;  %613 = vpow2.f32 %v390_v20  ;;  %v398_v33 = vmul.f32 1.442695, %v377_v62  ;;  %v370_v37 = vmul.f32 %v355_v52, %v1158_v51 }
  0x5d   :  { %v382_v19 = vadd.f32 %v366_v22, %v349_v54  ;;  %615 = vpow2.f32 %v392_v5  ;;  %v400_v45 = vmul.f32 1.442695, %v378_v48  ;;  %v371_v21 = vmul.f32 %v355_v52, %v1161_v60 }
  0x5e   :  { %v383_v43 = vadd.f32 %v367_v18, %v350_v41  ;;  %617 = vpow2.f32 %v394_v7  ;;  %v402_v31 = vmul.f32 1.442695, %v379_v15  ;;  %v1163_v16 = vshrl.u32 %v921_v24, 9 }
  0x5f   :  { %v384_v6 = vadd.f32 %v368_v53, %v351_v23  ;;  %619 = vpow2.f32 %v396_v59  ;;  %v404_v25 = vmul.f32 1.442695, %v380_v44  ;;  %v1164_v56 = vshrl.u32 %v923_v13, 9 }
  0x60   :  { %v1010_v57 = vcvt.s32.f32 %v1163_v16  ;;  %v385_v34 = vadd.f32 %v369_v42, %v352_v58  ;;  %621 = vpow2.f32 %v398_v33  ;;  %v406_v5 = vmul.f32 1.442695, %v381_v55 }
  0x61   :  { %v1014_v26 = vcvt.s32.f32 %v1164_v56  ;;  %v606_v54 = vpop.eup %605  ;;  %v292_v52 = vadd.f32 0.5, %v927_v61  ;;  %v386_v41 = vadd.f32 %v370_v37, %v353_v27  ;;  %623 = vpow2.f32 %v400_v45 }
  0x62   :  { %v408_v7 = vmul.f32 1.442695, %v382_v19  ;;  %v293_v24 = vadd.f32 0.5, %v929_v32  ;;  %v387_v30 = vadd.f32 %v371_v21, %v354_v49  ;;  %625 = vpow2.f32 %v402_v31 }
  0x63   :  { %v410_v23 = vmul.f32 1.442695, %v383_v43  ;;  %v608_v50 = vpop.eup %607  ;;  %v294_v46 = vadd.f32 0.5, %v931_v35  ;;  %v295_v13 = vadd.f32 0.5, %v933_v39  ;;  %627 = vpow2.f32 %v404_v25 }
  0x64   :  { %v412_v58 = vmul.f32 1.442695, %v384_v6  ;;  %v610_v17 = vpop.eup %609  ;;  %v296_v22 = vadd.f32 0.5, %v935_v40  ;;  %629 = vpow2.f32 %v406_v5  ;;  %v414_v61 = vmul.f32 1.442695, %v385_v34 }
  0x65   :  { %v437_v27 = vmul.f32 0.6931472, %v606_v54  ;;  %v612_v62 = vpop.eup %611  ;;  %v297_v48 = vadd.f32 0.5, %v937_v28  ;;  %631 = vpow2.f32 %v408_v7  ;;  %v416_v32 = vmul.f32 1.442695, %v386_v41 }
  0x66   :  { %v439_v49 = vmul.f32 0.6931472, %v608_v50  ;;  %v614_v20 = vpop.eup %613  ;;  %633 = vpow2.f32 %v410_v23  ;;  %v418_v18 = vmul.f32 1.442695, %v387_v30  ;;  %v420_v35 = vadd.f32 1.0, %v612_v62 }
  0x67   :  { %v441_v15 = vmul.f32 0.6931472, %v610_v17  ;;  %v616_v39 = vpop.eup %615  ;;  %v298_v53 = vadd.f32 0.5, %v939_v29  ;;  %v308_v44 = vmul.f32 1.1920929e-07, %v292_v52  ;;  %635 = vpow2.f32 %v412_v58 }
  0x68   :  { %v421_v40 = vadd.f32 1.0, %v614_v20  ;;  %v618_v59 = vpop.eup %617  ;;  %v309_v42 = vmul.f32 1.1920929e-07, %v293_v24  ;;  %637 = vpow2.f32 %v414_v61  ;;  %v422_v55 = vadd.f32 1.0, %v616_v39 }
  0x69   :  { %v468_v33 = vmul.f32 %v437_v27, %v420_v35  ;;  %v620_v28 = vpop.eup %619  ;;  %v299_v37 = vadd.f32 0.5, %v941_v36  ;;  %v310_v19 = vmul.f32 1.1920929e-07, %v294_v46  ;;  %639 = vpow2.f32 %v416_v32 }
  0x6a   :  { %v469_v45 = vmul.f32 %v439_v49, %v421_v40  ;;  %v622_v21 = vpop.eup %621  ;;  %v311_v43 = vmul.f32 1.1920929e-07, %v295_v13  ;;  %641 = vpow2.f32 %v418_v18  ;;  %v470_v31 = vmul.f32 %v441_v15, %v422_v55 }
  0x6b   :  { %v500_v29 = vsel %vm484_vm0, %v468_v33, -inf  ;;  %v624_v16 = vpop.eup %623  ;;  %v300_v6 = vadd.f32 0.5, %v943_v14  ;;  %v312_v25 = vmul.f32 1.1920929e-07, %v296_v22  ;;  %643 = vlog2.f32 %v308_v44 }
  0x6c   :  { %v501_v56 = vsel %vm485_vm1, %v469_v45, -inf  ;;  %516 = vst [vmem:[%s1125_s4] sm:$0xff] %v500_v29  ;;  %v626_v36 = vpop.eup %625  ;;  %v301_v34 = vadd.f32 0.5, %v945_v63  ;;  %v313_v5 = vmul.f32 1.1920929e-07, %v297_v48  ;;  %645 = vlog2.f32 %v309_v42 }
  0x6d   :  { %v502_v0 = vsel %vm486_vm2, %v470_v31, -inf  ;;  %517 = vst [vmem:[%s1125_s4 + $0x8] sm:$0xff] %v501_v56  ;;  %v628_v14 = vpop.eup %627  ;;  %v302_v1 = vadd.f32 0.5, %v947_v38  ;;  %v314_v54 = vmul.f32 1.1920929e-07, %v298_v53  ;;  %647 = vlog2.f32 %v310_v19 }
  0x6e   :  { %518 = vst [vmem:[%s1125_s4 + $0x10] sm:$0xff] %v502_v0  ;;  %v630_v52 = vpop.eup %629  ;;  %v303_v63 = vadd.f32 0.5, %v1010_v57  ;;  %v315_v41 = vmul.f32 1.1920929e-07, %v299_v37  ;;  %649 = vlog2.f32 %v311_v43  ;;  %v304_v7 = vadd.f32 0.5, %v1014_v26 }
  0x6f   :  { %v632_v2 = vpop.eup %631  ;;  %v316_v24 = vmul.f32 1.1920929e-07, %v300_v6  ;;  %651 = vlog2.f32 %v312_v25  ;;  %v317_v23 = vmul.f32 1.1920929e-07, %v301_v34  ;;  %v318_v50 = vmul.f32 1.1920929e-07, %v302_v1 }
  0x70   :  { %v634_v30 = vpop.eup %633  ;;  %653 = vlog2.f32 %v313_v5  ;;  %v319_v13 = vmul.f32 1.1920929e-07, %v303_v63  ;;  %v320_v17 = vmul.f32 1.1920929e-07, %v304_v7  ;;  %v423_v22 = vadd.f32 1.0, %v618_v59 }
  0x71   :  { %v636_v38 = vpop.eup %635  ;;  %655 = vlog2.f32 %v314_v54  ;;  %v424_v27 = vadd.f32 1.0, %v620_v28  ;;  %v425_v62 = vadd.f32 1.0, %v622_v21  ;;  %v426_v49 = vadd.f32 1.0, %v624_v16 }
  0x72   :  { %v638_v46 = vpop.eup %637  ;;  %657 = vlog2.f32 %v315_v41  ;;  %v427_v35 = vadd.f32 1.0, %v626_v36  ;;  %v428_v44 = vadd.f32 1.0, %v628_v14  ;;  %v429_v55 = vadd.f32 1.0, %v630_v52 }
  0x73   :  { %v640_v58 = vpop.eup %639  ;;  %659 = vlog2.f32 %v316_v24  ;;  %v430_v45 = vadd.f32 1.0, %v632_v2  ;;  %v431_v16 = vadd.f32 1.0, %v634_v30  ;;  %v432_v34 = vadd.f32 1.0, %v636_v38 }
  0x74   :  { %v642_v57 = vpop.eup %641  ;;  %661 = vlog2.f32 %v317_v23  ;;  %v433_v54 = vadd.f32 1.0, %v638_v46  ;;  %v434_v24 = vadd.f32 1.0, %v640_v58 }
  0x75   :  { %v644_v61 = vpop.eup %643  ;;  %663 = vlog2.f32 %v318_v50  ;;  %v435_v46 = vadd.f32 1.0, %v642_v57 }
  0x76   :  { %v646_v26 = vpop.eup %645  ;;  %v443_v48 = vmul.f32 0.6931472, %v644_v61  ;;  %665 = vlog2.f32 %v319_v13 }
  0x77   :  { %v648_v32 = vpop.eup %647  ;;  %v445_v20 = vmul.f32 0.6931472, %v646_v26  ;;  %667 = vlog2.f32 %v320_v17 }
  0x78   :  { %v650_v18 = vpop.eup %649  ;;  %v447_v15 = vmul.f32 0.6931472, %v648_v32  ;;  %v471_v39 = vmul.f32 %v443_v48, %v423_v22 }
  0x79   :  { %v652_v53 = vpop.eup %651  ;;  %v449_v40 = vmul.f32 0.6931472, %v650_v18  ;;  %v472_v59 = vmul.f32 %v445_v20, %v424_v27 }
  0x7a   :  { %v654_v42 = vpop.eup %653  ;;  %v451_v33 = vmul.f32 0.6931472, %v652_v53  ;;  %v473_v28 = vmul.f32 %v447_v15, %v425_v62  ;;  %v503_v37 = vsel %vm487_vm3, %v471_v39, -inf }
  0x7b   :  { %v656_v19 = vpop.eup %655  ;;  %v453_v21 = vmul.f32 0.6931472, %v654_v42  ;;  %v474_v43 = vmul.f32 %v449_v40, %v426_v49  ;;  %v504_v31 = vsel %vm488_vm4, %v472_v59, -inf  ;;  %519 = vst [vmem:[%s1125_s4 + $0x18] sm:$0xff] %v503_v37 }
  0x7c   :  { %v658_v29 = vpop.eup %657  ;;  %v455_v6 = vmul.f32 0.6931472, %v656_v19  ;;  %v475_v25 = vmul.f32 %v451_v33, %v427_v35  ;;  %v505_v36 = vsel %vm489_vm5, %v473_v28, -inf  ;;  %520 = vst [vmem:[%s1125_s4 + $0x20] sm:$0xff] %v504_v31 }
  0x7d   :  { %v660_v3 = vpop.eup %659  ;;  %v457_v5 = vmul.f32 0.6931472, %v658_v29  ;;  %v476_v4 = vmul.f32 %v453_v21, %v428_v44  ;;  %v506_v14 = vsel %vm490_vm6, %v474_v43, -inf  ;;  %521 = vst [vmem:[%s1125_s4 + $0x28] sm:$0xff] %v505_v36 }
  0x7e   :  { %v662_v1 = vpop.eup %661  ;;  %v459_v52 = vmul.f32 0.6931472, %v660_v3  ;;  %v477_v63 = vmul.f32 %v455_v6, %v429_v55  ;;  %v507_v2 = vsel %vm491_vm7, %v475_v25, -inf  ;;  %522 = vst [vmem:[%s1125_s4 + $0x30] sm:$0xff] %v506_v14 }
  0x7f   :  { %v664_v7 = vpop.eup %663  ;;  %v461_v30 = vmul.f32 0.6931472, %v662_v1  ;;  %v478_v23 = vmul.f32 %v457_v5, %v430_v45  ;;  %v508_v38 = vsel %vm492_vm8, %v476_v4, -inf  ;;  %523 = vst [vmem:[%s1125_s4 + $0x38] sm:$0xff] %v507_v2 }
  0x80   :  { %v666_v50 = vpop.eup %665  ;;  %v463_v13 = vmul.f32 0.6931472, %v664_v7  ;;  %v479_v17 = vmul.f32 %v459_v52, %v431_v16  ;;  %v509_v22 = vsel %vm493_vm9, %v477_v63, -inf  ;;  %524 = vst [vmem:[%s1125_s4 + $0x40] sm:$0xff] %v508_v38 }
  0x81   :  { %v668_v58 = vpop.eup %667  ;;  %v465_v61 = vmul.f32 0.6931472, %v666_v50  ;;  %v480_v27 = vmul.f32 %v461_v30, %v432_v34  ;;  %v510_v8 = vsel %vm494_vm10, %v478_v23, -inf  ;;  %525 = vst [vmem:[%s1125_s4 + $0x48] sm:$0xff] %v509_v22 }
  0x82   :  { %v467_v57 = vmul.f32 0.6931472, %v668_v58  ;;  %v481_v26 = vmul.f32 %v463_v13, %v433_v54  ;;  %v511_v9 = vsel %vm495_vm11, %v479_v17, -inf  ;;  %526 = vst [vmem:[%s1125_s4 + $0x50] sm:$0xff] %v510_v8 }
  0x83   :  { %v482_v48 = vmul.f32 %v465_v61, %v434_v24  ;;  %v512_v32 = vsel %vm496_vm12, %v480_v27, -inf  ;;  %527 = vst [vmem:[%s1125_s4 + $0x58] sm:$0xff] %v511_v9 }
  0x84   :  { %v483_v10 = vmul.f32 %v467_v57, %v435_v46  ;;  %v513_v49 = vsel %vm497_vm13, %v481_v26, -inf  ;;  %528 = vst [vmem:[%s1125_s4 + $0x60] sm:$0xff] %v512_v32 }
  0x85   :  { %v514_v20 = vsel %vm498_vm14, %v482_v48, -inf  ;;  %529 = vst [vmem:[%s1125_s4 + $0x68] sm:$0xff] %v513_v49 }
  0x86   :  { %v515_v12 = vsel %vm499_vm15, %v483_v10, -inf  ;;  %530 = vst [vmem:[%s1125_s4 + $0x70] sm:$0xff] %v514_v20 }
  0x87   :  { %531 = vst [vmem:[%s1125_s4 + $0x78] sm:$0xff] %v515_v12 }
  0xa6   :  { %v570_v62 = vpop.xlane.xlu0 %569 }
  0xa7   :  { %v572_v11 = vcvt.f32.s32 %v570_v62 }
  0xa9   :  { %v573_v35 = vshll.u32 %v572_v11, 16 }
  0xaa   :  { %v568_v47 = vpop.xlane.xlu0 %567 }
  0xab   :  { %v571_v18 = vcvt.f32.s32 %v568_v47 }
  0xad   :  { %v574_v51 = vadd.s32 %v573_v35, %v571_v18 }
  0xaf   :  { %v575_v15 = vrot.slane %v574_v51, 4 }
  0xb1   :  { %v576_v39 = vadd.s32 %v575_v15, %v574_v51 }
  0xb3   :  { %v577_v53 = vrot.slane %v576_v39, 2 }
  0xb5   :  { %v578_v44 = vadd.s32 %v577_v53, %v576_v39 }
  0xb7   :  { %v579_v40 = vrot.slane %v578_v44, 1 }
  0xb9   :  { %v580_v59 = vadd.s32 %v579_v40, %v578_v44 }
  0xbb   :  { %601 = vpush %v580_v59 }
  0xec   :  { %s602_s7 = spop %601 }
  0xed   :  { %583 = sst [smem:[#allocation5]] %s602_s7 }
  0xee   :  { %678 = shalt.err (!%p675_p2)
}
  0xef   :  { %s682_s14 = smov [#allocation5]  }
  0xf0   :  { %593 = dma.smem_to_hbm %s682_s14, 16, %s1126_s5, [#allocation6]  }
  0xf1   :  { %679 = dma.done.wait [#allocation6], 16  }
  0xf2   :  { %680 = vsyncadd [#allocation6], 4294967280 }
  0xf3   :  { %599 = sfence }
  0xf4   :  { %600 = vsyncpa [#allocation6], 1 }

// kernel: adaptive_edge_dropping.3
= control target key start
LH: loop header
LB: loop body
LE: loop exit
PB: predicated region body
PF: predicated region fallthrough
CT: control target
= control target key end

     0   :  { %v45_v1 = vlaneseq  ;;  %s1003_s0 = inlined_call_operand.<no memory space> [shape: f32[1], index: 0, kind: input, shape index: {}]   ;;  %s1004_s1 = inlined_call_operand.<no memory space> [shape: f32[1], index: 1, kind: input, shape index: {}]   ;;  %s1005_s2 = inlined_call_operand.<no memory space> [shape: s32[1], index: 2, kind: input, shape index: {}]   ;;  %s1006_s3 = inlined_call_operand.<no memory space> [shape: f32[1], index: 3, kind: input, shape index: {}]   ;;  %s1007_s4 = inlined_call_operand.vmem [shape: f32[128,128], index: 4, kind: input, shape index: {}]   ;;  %s1008_s5 = inlined_call_operand.hbm [shape: f32[128,128], index: 5, kind: output, shape index: {}]  }
   0x1   :  { %v711_v0 = vld [vmem:[%s1007_s4] sm:$0xff]  ;;  %s323_s22 = ssub.f32 0.0, %s1003_s0  ;;  %v719_v2 = vld [vmem:[%s1007_s4 + $0x8] sm:$0xff]  ;;  %s113_s27 = smul.u32 2654435761, %s1005_s2  ;;  %v732_v6 = vstv %s1004_s1  ;;  %v748_v16 = vld [vmem:[%s1007_s4 + $0x10] sm:$0xff] }
   0x2   :  { %v724_v3 = vshrl.u32 %v45_v1, 7  ;;  %v726_v4 = vand.u32 127, %v45_v1  ;;  %v324_v5 = vsub.f32 1.0, %v711_v0  ;;  %v325_v7 = vsub.f32 1.0, %v719_v2  ;;  %v753_v18 = vld [vmem:[%s1007_s4 + $0x18] sm:$0xff] }
   0x3   :  { %v736_v9 = vstv %s323_s22  ;;  %v740_v12 = vstv %s113_s27  ;;  %v358_v14 = vmul.f32 %v732_v6, %v711_v0 }
   0x4   :  { %v81_v8 = vmul.u32 128, %v724_v3  ;;  %v47_v10 = vadd.s32 8, %v724_v3  ;;  %v48_v11 = vadd.s32 16, %v724_v3 }
   0x6   :  { %v97_v13 = vadd.s32 %v81_v8, %v726_v4  ;;  %v82_v15 = vmul.u32 128, %v47_v10  ;;  %v83_v17 = vmul.u32 128, %v48_v11 }
   0x7   :  { %14 = vsyncpa [#allocation7], 0  ;;  %v341_v19 = vmul.f32 %v736_v9, %v324_v5  ;;  %v342_v20 = vmul.f32 %v736_v9, %v325_v7  ;;  %v359_v21 = vmul.f32 %v732_v6, %v719_v2  ;;  %v49_v22 = vadd.s32 24, %v724_v3  ;;  %v773_v39 = vld [vmem:[%s1007_s4 + $0x20] sm:$0xff] }
   0x8   :  { %v115_v23 = vadd.s32 %v740_v12, %v97_v13  ;;  %v98_v24 = vadd.s32 %v82_v15, %v726_v4  ;;  %v99_v25 = vadd.s32 %v83_v17, %v726_v4  ;;  %v326_v26 = vsub.f32 1.0, %v748_v16  ;;  %v791_v15 = vld [vmem:[%s1007_s4 + $0x28] sm:$0xff] }
   0x9   :  { %v84_v27 = vmul.u32 128, %v49_v22  ;;  %v327_v28 = vsub.f32 1.0, %v753_v18  ;;  %v374_v32 = vadd.f32 %v358_v14, %v341_v19  ;;  %v375_v33 = vadd.f32 %v359_v21, %v342_v20 }
   0xa   :  { %v131_v29 = vshrl.u32 %v115_v23, 16  ;;  %v116_v30 = vadd.s32 %v740_v12, %v98_v24  ;;  %v117_v31 = vadd.s32 %v740_v12, %v99_v25  ;;  %v360_v34 = vmul.f32 %v732_v6, %v748_v16 }
   0xb   :  { %v100_v35 = vadd.s32 %v84_v27, %v726_v4  ;;  %v50_v40 = vadd.s32 32, %v724_v3  ;;  %v343_v41 = vmul.f32 %v736_v9, %v326_v26  ;;  %v344_v43 = vmul.f32 %v736_v9, %v327_v28 }
   0xc   :  { %v147_v36 = vxor.u32 %v131_v29, %v115_v23  ;;  %v132_v37 = vshrl.u32 %v116_v30, 16  ;;  %v133_v38 = vshrl.u32 %v117_v31, 16  ;;  %v361_v44 = vmul.f32 %v732_v6, %v753_v18 }
   0xd   :  { %v118_v42 = vadd.s32 %v740_v12, %v100_v35  ;;  %v85_v48 = vmul.u32 128, %v50_v40  ;;  %v390_v49 = vmul.f32 1.442695, %v374_v32  ;;  %v392_v50 = vmul.f32 1.442695, %v375_v33 }
   0xe   :  { %v163_v45 = vmul.u32 569420461, %v147_v36  ;;  %v148_v46 = vxor.u32 %v132_v37, %v116_v30  ;;  %v149_v47 = vxor.u32 %v133_v38, %v117_v31  ;;  %v328_v52 = vsub.f32 1.0, %v773_v39 }
   0xf   :  { %v134_v51 = vshrl.u32 %v118_v42, 16  ;;  %v101_v56 = vadd.s32 %v85_v48, %v726_v4  ;;  %v376_v57 = vadd.f32 %v360_v34, %v343_v41  ;;  %v377_v59 = vadd.f32 %v361_v44, %v344_v43 }
  0x10   :  { %v179_v53 = vshrl.u32 %v163_v45, 15  ;;  %v164_v54 = vmul.u32 569420461, %v148_v46  ;;  %v165_v55 = vmul.u32 569420461, %v149_v47  ;;  %v51_v60 = vadd.s32 40, %v724_v3 }
  0x11   :  { %v150_v58 = vxor.u32 %v134_v51, %v118_v42  ;;  %v119_v1 = vadd.s32 %v740_v12, %v101_v56  ;;  %v345_v7 = vmul.f32 %v736_v9, %v328_v52  ;;  %v362_v8 = vmul.f32 %v732_v6, %v773_v39 }
  0x12   :  { %v195_v61 = vxor.u32 %v179_v53, %v163_v45  ;;  %v180_v62 = vshrl.u32 %v164_v54, 15  ;;  %v181_v63 = vshrl.u32 %v165_v55, 15  ;;  %v86_v10 = vmul.u32 128, %v51_v60 }
  0x13   :  { %v166_v5 = vmul.u32 569420461, %v150_v58  ;;  %587 = vpow2.f32 %v390_v49  ;;  %v394_v17 = vmul.f32 1.442695, %v376_v57  ;;  %v396_v20 = vmul.f32 1.442695, %v377_v59 }
  0x14   :  { %v211_v11 = vmul.u32 1935289751, %v195_v61  ;;  %v196_v13 = vxor.u32 %v180_v62, %v164_v54  ;;  %v197_v14 = vxor.u32 %v181_v63, %v165_v55  ;;  %v135_v21 = vshrl.u32 %v119_v1, 16 }
  0x15   :  { %v182_v19 = vshrl.u32 %v166_v5, 15  ;;  %v102_v25 = vadd.s32 %v86_v10, %v726_v4  ;;  %589 = vpow2.f32 %v392_v50  ;;  %v378_v28 = vadd.f32 %v362_v8, %v345_v7  ;;  %v808_v10 = vld [vmem:[%s1007_s4 + $0x30] sm:$0xff] }
  0x16   :  { %v227_v22 = vshrl.u32 %v211_v11, 15  ;;  %v212_v23 = vmul.u32 1935289751, %v196_v13  ;;  %v213_v24 = vmul.u32 1935289751, %v197_v14  ;;  %v151_v27 = vxor.u32 %v135_v21, %v119_v1 }
  0x17   :  { %v198_v26 = vxor.u32 %v182_v19, %v166_v5  ;;  %v329_v32 = vsub.f32 1.0, %v791_v15  ;;  %591 = vpow2.f32 %v394_v17  ;;  %v120_v35 = vadd.s32 %v740_v12, %v102_v25 }
  0x18   :  { %v243_v29 = vxor.u32 %v227_v22, %v211_v11  ;;  %v228_v30 = vshrl.u32 %v212_v23, 15  ;;  %v229_v31 = vshrl.u32 %v213_v24, 15  ;;  %v167_v34 = vmul.u32 569420461, %v151_v27 }
  0x19   :  { %v214_v33 = vmul.u32 1935289751, %v198_v26  ;;  %593 = vpow2.f32 %v396_v20  ;;  %v398_v42 = vmul.f32 1.442695, %v378_v28  ;;  %v136_v43 = vshrl.u32 %v120_v35, 16 }
  0x1a   :  { %v259_v36 = vshrl.u32 %v243_v29, 9  ;;  %v244_v37 = vxor.u32 %v228_v30, %v212_v23  ;;  %v245_v38 = vxor.u32 %v229_v31, %v213_v24  ;;  %v183_v41 = vshrl.u32 %v167_v34, 15  ;;  %v814_v24 = vld [vmem:[%s1007_s4 + $0x38] sm:$0xff] }
  0x1b   :  { %v230_v40 = vshrl.u32 %v214_v33, 15  ;;  %v346_v47 = vmul.f32 %v736_v9, %v329_v32  ;;  %v152_v50 = vxor.u32 %v136_v43, %v120_v35  ;;  %v363_v51 = vmul.f32 %v732_v6, %v791_v15 }
  0x1c   :  { %v275_v44 = vcvt.s32.f32 %v259_v36  ;;  %v260_v45 = vshrl.u32 %v244_v37, 9  ;;  %v261_v46 = vshrl.u32 %v245_v38, 9  ;;  %v199_v49 = vxor.u32 %v183_v41, %v167_v34 }
  0x1d   :  { %v246_v48 = vxor.u32 %v230_v40, %v214_v33  ;;  %v588_v52 = vpop.eup %587  ;;  %v52_v56 = vadd.s32 48, %v724_v3  ;;  %595 = vpow2.f32 %v398_v42  ;;  %v168_v59 = vmul.u32 569420461, %v152_v50 }
  0x1e   :  { %v291_v53 = vadd.f32 0.5, %v275_v44  ;;  %v276_v54 = vcvt.s32.f32 %v260_v45  ;;  %v277_v55 = vcvt.s32.f32 %v261_v46  ;;  %v215_v58 = vmul.u32 1935289751, %v199_v49 }
  0x1f   :  { %v262_v57 = vshrl.u32 %v246_v48, 9  ;;  %v803_v61 = vstv %s1006_s3  ;;  %v590_v1 = vpop.eup %589  ;;  %v184_v8 = vshrl.u32 %v168_v59, 15  ;;  %v87_v11 = vmul.u32 128, %v52_v56 }
  0x20   :  { %v307_v60 = vmul.f32 1.1920929e-07, %v291_v53  ;;  %v292_v62 = vadd.f32 0.5, %v276_v54  ;;  %v293_v63 = vadd.f32 0.5, %v277_v55  ;;  %v231_v7 = vshrl.u32 %v215_v58, 15 }
  0x21   :  { %v278_v5 = vcvt.s32.f32 %v262_v57  ;;  %v379_v17 = vadd.f32 %v363_v51, %v346_v47  ;;  %v592_v19 = vpop.eup %591  ;;  %v200_v22 = vxor.u32 %v184_v8, %v168_v59  ;;  %v103_v23 = vadd.s32 %v87_v11, %v726_v4 }
  0x22   :  { %597 = vlog2.f32 %v307_v60  ;;  %v308_v13 = vmul.f32 1.1920929e-07, %v292_v62  ;;  %v309_v14 = vmul.f32 1.1920929e-07, %v293_v63  ;;  %v247_v21 = vxor.u32 %v231_v7, %v215_v58  ;;  %v838_v60 = vld [vmem:[%s1007_s4 + $0x40] sm:$0xff] }
  0x23   :  { %v294_v20 = vadd.f32 0.5, %v278_v5  ;;  %v594_v25 = vpop.eup %593  ;;  %v422_v26 = vadd.f32 1.0, %v588_v52  ;;  %v330_v27 = vsub.f32 1.0, %v808_v10  ;;  %v53_v28 = vadd.s32 56, %v724_v3 }
  0x24   :  { %599 = vlog2.f32 %v308_v13  ;;  %v263_v30 = vshrl.u32 %v247_v21, 9  ;;  %v216_v31 = vmul.u32 1935289751, %v200_v22  ;;  %vm486_vm0 = vcmp.ne.f32.partialorder %v711_v0, 0.0 }
  0x25   :  { %601 = vlog2.f32 %v309_v14  ;;  %v310_v29 = vmul.f32 1.1920929e-07, %v294_v20  ;;  %v423_v32 = vadd.f32 1.0, %v590_v1  ;;  %v121_v33 = vadd.s32 %v740_v12, %v103_v23 }
  0x26   :  { %v88_v34 = vmul.u32 128, %v53_v28  ;;  %v331_v35 = vsub.f32 1.0, %v814_v24  ;;  %v279_v36 = vcvt.s32.f32 %v263_v30  ;;  %v232_v37 = vshrl.u32 %v216_v31, 15 }
  0x27   :  { %603 = vlog2.f32 %v310_v29  ;;  %v400_v38 = vmul.f32 1.442695, %v379_v17  ;;  %vm487_vm1 = vcmp.ne.f32.partialorder %v719_v2, 0.0  ;;  %v424_v40 = vadd.f32 1.0, %v592_v19  ;;  %v596_v44 = vpop.eup %595 }
  0x28   :  { %v137_v41 = vshrl.u32 %v121_v33, 16  ;;  %v347_v42 = vmul.f32 %v736_v9, %v330_v27  ;;  %v104_v43 = vadd.s32 %v88_v34, %v726_v4  ;;  %vm488_vm2 = vcmp.ne.f32.partialorder %v748_v16, 0.0 }
  0x29   :  { %v295_v45 = vadd.f32 0.5, %v279_v36  ;;  %v248_v46 = vxor.u32 %v232_v37, %v216_v31  ;;  %v364_v47 = vmul.f32 %v732_v6, %v808_v10  ;;  %v365_v48 = vmul.f32 %v732_v6, %v814_v24 }
  0x2a   :  { %v153_v49 = vxor.u32 %v137_v41, %v121_v33  ;;  %v122_v50 = vadd.s32 %v740_v12, %v104_v43  ;;  %v348_v51 = vmul.f32 %v736_v9, %v331_v35  ;;  %v54_v52 = vadd.s32 64, %v724_v3 }
  0x2b   :  { %v425_v53 = vadd.f32 1.0, %v594_v25  ;;  %vm489_vm3 = vcmp.ne.f32.partialorder %v753_v18, 0.0  ;;  %v311_v54 = vmul.f32 1.1920929e-07, %v295_v45  ;;  %v264_v55 = vshrl.u32 %v248_v46, 9 }
  0x2c   :  { %605 = vpow2.f32 %v400_v38  ;;  %v598_v56 = vpop.eup %597  ;;  %v833_v57 = vadd.f32 1.0, %v596_v44  ;;  %v169_v58 = vmul.u32 569420461, %v153_v49  ;;  %v138_v59 = vshrl.u32 %v122_v50, 16 }
  0x2d   :  { %v89_v62 = vmul.u32 128, %v54_v52  ;;  %v439_v63 = vmul.f32 0.6931472, %v598_v56  ;;  %607 = vlog2.f32 %v311_v54  ;;  %v280_v1 = vcvt.s32.f32 %v264_v55 }
  0x2e   :  { %v380_v5 = vadd.f32 %v364_v47, %v347_v42  ;;  %v600_v7 = vpop.eup %599  ;;  %v185_v8 = vshrl.u32 %v169_v58, 15  ;;  %v154_v11 = vxor.u32 %v138_v59, %v122_v50  ;;  %v381_v13 = vadd.f32 %v365_v48, %v348_v51 }
  0x2f   :  { %v105_v14 = vadd.s32 %v89_v62, %v726_v4  ;;  %v602_v17 = vpop.eup %601  ;;  %v470_v19 = vmul.f32 %v439_v63, %v422_v26  ;;  %v441_v20 = vmul.f32 0.6931472, %v600_v7  ;;  %v296_v21 = vadd.f32 0.5, %v280_v1 }
  0x30   :  { %v332_v22 = vsub.f32 1.0, %v838_v60  ;;  %v443_v23 = vmul.f32 0.6931472, %v602_v17  ;;  %v201_v25 = vxor.u32 %v185_v8, %v169_v58  ;;  %v170_v27 = vmul.u32 569420461, %v154_v11 }
  0x31   :  { %v366_v28 = vmul.f32 %v732_v6, %v838_v60  ;;  %v604_v29 = vpop.eup %603  ;;  %v502_v30 = vsel %vm486_vm0, %v470_v19, -inf  ;;  %v471_v31 = vmul.f32 %v441_v20, %v423_v32  ;;  %vm490_vm4 = vcmp.ne.f32.partialorder %v773_v39, 0.0 }
  0x32   :  { %v312_v33 = vmul.f32 1.1920929e-07, %v296_v21  ;;  %v123_v26 = vadd.s32 %v740_v12, %v105_v14  ;;  %vm520_vm5 = vcmp.ge.f32.partialorder %v502_v30, %v803_v61  ;;  %v472_v34 = vmul.f32 %v443_v23, %v424_v40 }
  0x33   :  { %v445_v35 = vmul.f32 0.6931472, %v604_v29  ;;  %v217_v36 = vmul.u32 1935289751, %v201_v25  ;;  %v536_v37 = vsel %vm520_vm5, 0.0, %v711_v0  ;;  %v503_v38 = vsel %vm487_vm1, %v471_v31, -inf }
  0x34   :  { %609 = vlog2.f32 %v312_v33  ;;  %v186_v41 = vshrl.u32 %v170_v27, 15  ;;  %552 = vst [vmem:[#allocation6] sm:$0xff] %v536_v37  ;;  %vm521_vm6 = vcmp.ge.f32.partialorder %v503_v38, %v803_v61  ;;  %v504_v32 = vsel %vm488_vm2, %v472_v34, -inf  ;;  %v882_v31 = vld [vmem:[%s1007_s4 + $0x50] sm:$0xff] }
  0x35   :  { %v473_v42 = vmul.f32 %v445_v35, %v425_v53  ;;  %v233_v43 = vshrl.u32 %v217_v36, 15  ;;  %v537_v40 = vsel %vm521_vm6, 0.0, %v719_v2  ;;  %vm522_vm7 = vcmp.ge.f32.partialorder %v504_v32, %v803_v61 }
  0x36   :  { %v606_v44 = vpop.eup %605  ;;  %v202_v45 = vxor.u32 %v186_v41, %v170_v27  ;;  %v349_v0 = vmul.f32 %v736_v9, %v332_v22  ;;  %553 = vst [vmem:[#allocation6 + $0x8] sm:$0xff] %v537_v40  ;;  %v538_v46 = vsel %vm522_vm7, 0.0, %v748_v16  ;;  %v139_v49 = vshrl.u32 %v123_v26, 16  ;;  %v866_v16 = vld [vmem:[%s1007_s4 + $0x48] sm:$0xff] }
  0x37   :  { %v505_v47 = vsel %vm489_vm3, %v473_v42, -inf  ;;  %v249_v48 = vxor.u32 %v233_v43, %v217_v36  ;;  %v608_v50 = vpop.eup %607  ;;  %554 = vst [vmem:[#allocation6 + $0x10] sm:$0xff] %v538_v46  ;;  %v402_v51 = vmul.f32 1.442695, %v380_v5  ;;  %v404_v2 = vmul.f32 1.442695, %v381_v13 }
  0x38   :  { %vm523_vm8 = vcmp.ge.f32.partialorder %v505_v47, %v803_v61  ;;  %v218_v52 = vmul.u32 1935289751, %v202_v45  ;;  %v447_v54 = vmul.f32 0.6931472, %v608_v50  ;;  %v155_v56 = vxor.u32 %v139_v49, %v123_v26 }
  0x39   :  { %v539_v53 = vsel %vm523_vm8, 0.0, %v753_v18  ;;  %v265_v55 = vshrl.u32 %v249_v48, 9  ;;  %vm491_vm9 = vcmp.ne.f32.partialorder %v791_v15, 0.0  ;;  %v382_v59 = vadd.f32 %v366_v28, %v349_v0 }
  0x3a   :  { %555 = vst [vmem:[#allocation6 + $0x18] sm:$0xff] %v539_v53  ;;  %v234_v58 = vshrl.u32 %v218_v52, 15  ;;  %v55_v62 = vadd.s32 72, %v724_v3  ;;  %v474_v63 = vmul.f32 %v447_v54, %v833_v57  ;;  %v427_v1 = vadd.f32 1.0, %v606_v44 }
  0x3b   :  { %v281_v5 = vcvt.s32.f32 %v265_v55  ;;  %v171_v18 = vmul.u32 569420461, %v155_v56  ;;  %611 = vpow2.f32 %v402_v51  ;;  %v333_v11 = vsub.f32 1.0, %v866_v16 }
  0x3c   :  { %v250_v7 = vxor.u32 %v234_v58, %v218_v52  ;;  %v90_v8 = vmul.u32 128, %v55_v62  ;;  %v506_v13 = vsel %vm490_vm4, %v474_v63, -inf  ;;  %613 = vpow2.f32 %v404_v2 }
  0x3d   :  { %v297_v14 = vadd.f32 0.5, %v281_v5  ;;  %v187_v17 = vshrl.u32 %v171_v18, 15  ;;  %vm524_vm10 = vcmp.ge.f32.partialorder %v506_v13, %v803_v61  ;;  %v406_v21 = vmul.f32 1.442695, %v382_v59 }
  0x3e   :  { %v610_v19 = vpop.eup %609  ;;  %v266_v20 = vshrl.u32 %v250_v7, 9  ;;  %v106_v57 = vadd.s32 %v90_v8, %v726_v4  ;;  %v540_v22 = vsel %vm524_vm10, 0.0, %v773_v39  ;;  %v350_v30 = vmul.f32 %v736_v9, %v333_v11 }
  0x3f   :  { %v449_v23 = vmul.f32 0.6931472, %v610_v19  ;;  %v313_v25 = vmul.f32 1.1920929e-07, %v297_v14  ;;  %v203_v27 = vxor.u32 %v187_v17, %v171_v18  ;;  %556 = vst [vmem:[#allocation6 + $0x20] sm:$0xff] %v540_v22  ;;  %v56_v33 = vadd.s32 80, %v724_v3 }
  0x40   :  { %v282_v28 = vcvt.s32.f32 %v266_v20  ;;  %v124_v29 = vadd.s32 %v740_v12, %v106_v57  ;;  %v367_v39 = vmul.f32 %v732_v6, %v866_v16  ;;  %v334_v32 = vsub.f32 1.0, %v882_v31  ;;  %v905_v20 = vld [vmem:[%s1007_s4 + $0x58] sm:$0xff] }
  0x41   :  { %v475_v26 = vmul.f32 %v449_v23, %v427_v1  ;;  %615 = vlog2.f32 %v313_v25  ;;  %v219_v34 = vmul.u32 1935289751, %v203_v27  ;;  %v91_v37 = vmul.u32 128, %v56_v33 }
  0x42   :  { %v298_v35 = vadd.f32 0.5, %v282_v28  ;;  %617 = vpow2.f32 %v406_v21  ;;  %v140_v36 = vshrl.u32 %v124_v29, 16  ;;  %v383_v0 = vadd.f32 %v367_v39, %v350_v30 }
  0x43   :  { %v507_v38 = vsel %vm491_vm9, %v475_v26, -inf  ;;  %v235_v41 = vshrl.u32 %v219_v34, 15  ;;  %v107_v44 = vadd.s32 %v91_v37, %v726_v4  ;;  %v351_v51 = vmul.f32 %v736_v9, %v334_v32  ;;  %v915_v37 = vld [vmem:[%s1007_s4 + $0x60] sm:$0xff] }
  0x44   :  { %vm525_vm11 = vcmp.ge.f32.partialorder %v507_v38, %v803_v61  ;;  %v314_v42 = vmul.f32 1.1920929e-07, %v298_v35  ;;  %v156_v43 = vxor.u32 %v140_v36, %v124_v29  ;;  %v368_v52 = vmul.f32 %v732_v6, %v882_v31 }
  0x45   :  { %v541_v40 = vsel %vm525_vm11, 0.0, %v791_v15  ;;  %v251_v45 = vxor.u32 %v235_v41, %v219_v34  ;;  %v612_v46 = vpop.eup %611  ;;  %v125_v48 = vadd.s32 %v740_v12, %v107_v44  ;;  %v57_v2 = vadd.s32 88, %v724_v3 }
  0x46   :  { %557 = vst [vmem:[#allocation6 + $0x28] sm:$0xff] %v541_v40  ;;  %619 = vlog2.f32 %v314_v42  ;;  %v172_v47 = vmul.u32 569420461, %v156_v43  ;;  %v614_v49 = vpop.eup %613  ;;  %vm492_vm12 = vcmp.ne.f32.partialorder %v808_v10, 0.0  ;;  %v408_v55 = vmul.f32 1.442695, %v383_v0 }
  0x47   :  { %v267_v50 = vshrl.u32 %v251_v45, 9  ;;  %v141_v54 = vshrl.u32 %v125_v48, 16  ;;  %v92_v56 = vmul.u32 128, %v57_v2  ;;  %v428_v58 = vadd.f32 1.0, %v612_v46 }
  0x48   :  { %v188_v53 = vshrl.u32 %v172_v47, 15  ;;  %v58_v63 = vadd.s32 96, %v724_v3  ;;  %vm493_vm13 = vcmp.ne.f32.partialorder %v814_v24, 0.0  ;;  %v384_v18 = vadd.f32 %v368_v52, %v351_v51 }
  0x49   :  { %v283_v15 = vcvt.s32.f32 %v267_v50  ;;  %v157_v62 = vxor.u32 %v141_v54, %v125_v48  ;;  %v108_v7 = vadd.s32 %v92_v56, %v726_v4  ;;  %v429_v17 = vadd.f32 1.0, %v614_v49 }
  0x4a   :  { %v204_v59 = vxor.u32 %v188_v53, %v172_v47  ;;  %621 = vpow2.f32 %v408_v55  ;;  %v93_v25 = vmul.u32 128, %v58_v63  ;;  %v410_v28 = vmul.f32 1.442695, %v384_v18 }
  0x4b   :  { %v616_v1 = vpop.eup %615  ;;  %v299_v5 = vadd.f32 0.5, %v283_v15  ;;  %v173_v14 = vmul.u32 569420461, %v157_v62  ;;  %v126_v21 = vadd.s32 %v740_v12, %v108_v7  ;;  %v335_v39 = vsub.f32 1.0, %v905_v20 }
  0x4c   :  { %v618_v8 = vpop.eup %617  ;;  %v451_v11 = vmul.f32 0.6931472, %v616_v1  ;;  %v220_v13 = vmul.u32 1935289751, %v204_v59  ;;  %v109_v38 = vadd.s32 %v93_v25, %v726_v4  ;;  %v369_v43 = vmul.f32 %v732_v6, %v905_v20 }
  0x4d   :  { %v315_v19 = vmul.f32 1.1920929e-07, %v299_v5  ;;  %v189_v23 = vshrl.u32 %v173_v14, 15  ;;  %v430_v27 = vadd.f32 1.0, %v618_v8  ;;  %v142_v29 = vshrl.u32 %v126_v21, 16 }
  0x4e   :  { %v476_v57 = vmul.f32 %v451_v11, %v428_v58  ;;  %v236_v22 = vshrl.u32 %v220_v13, 15  ;;  %v127_v45 = vadd.s32 %v740_v12, %v109_v38  ;;  %v59_v0 = vadd.s32 104, %v724_v3  ;;  %v932_v58 = vld [vmem:[%s1007_s4 + $0x68] sm:$0xff] }
  0x4f   :  { %623 = vlog2.f32 %v315_v19  ;;  %v205_v34 = vxor.u32 %v189_v23, %v173_v14  ;;  %v158_v36 = vxor.u32 %v142_v29, %v126_v21  ;;  %v352_v48 = vmul.f32 %v736_v9, %v335_v39 }
  0x50   :  { %v620_v30 = vpop.eup %619  ;;  %v508_v33 = vsel %vm492_vm12, %v476_v57, -inf  ;;  %v252_v26 = vxor.u32 %v236_v22, %v220_v13  ;;  %v336_v49 = vsub.f32 1.0, %v915_v37  ;;  %v143_v51 = vshrl.u32 %v127_v45, 16 }
  0x51   :  { %vm526_vm14 = vcmp.ge.f32.partialorder %v508_v33, %v803_v61  ;;  %v453_v35 = vmul.f32 0.6931472, %v620_v30  ;;  %v221_v42 = vmul.u32 1935289751, %v205_v34  ;;  %v174_v40 = vmul.u32 569420461, %v158_v36 }
  0x52   :  { %v542_v41 = vsel %vm526_vm14, 0.0, %v808_v10  ;;  %v268_v32 = vshrl.u32 %v252_v26, 9  ;;  %v94_v52 = vmul.u32 128, %v59_v0  ;;  %625 = vpow2.f32 %v410_v28 }
  0x53   :  { %558 = vst [vmem:[#allocation6 + $0x30] sm:$0xff] %v542_v41  ;;  %v477_v44 = vmul.f32 %v453_v35, %v429_v17  ;;  %v237_v47 = vshrl.u32 %v221_v42, 15  ;;  %v190_v50 = vshrl.u32 %v174_v40, 15  ;;  %v159_v56 = vxor.u32 %v143_v51, %v127_v45 }
  0x54   :  { %v284_v46 = vcvt.s32.f32 %v268_v32  ;;  %v622_v54 = vpop.eup %621  ;;  %v110_v59 = vadd.s32 %v94_v52, %v726_v4  ;;  %v385_v1 = vadd.f32 %v369_v43, %v352_v48  ;;  %v370_v5 = vmul.f32 %v732_v6, %v915_v37 }
  0x55   :  { %v509_v10 = vsel %vm493_vm13, %v477_v44, -inf  ;;  %v253_v53 = vxor.u32 %v237_v47, %v221_v42  ;;  %v206_v55 = vxor.u32 %v190_v50, %v174_v40  ;;  %v175_v8 = vmul.u32 569420461, %v159_v56 }
  0x56   :  { %vm527_vm15 = vcmp.ge.f32.partialorder %v509_v10, %v803_v61  ;;  %v300_v2 = vadd.f32 0.5, %v284_v46  ;;  %v128_v11 = vadd.s32 %v740_v12, %v110_v59  ;;  %v337_v17 = vsub.f32 1.0, %v932_v58  ;;  %v951_v46 = vld [vmem:[%s1007_s4 + $0x70] sm:$0xff] }
  0x57   :  { %v543_v15 = vsel %vm527_vm15, 0.0, %v814_v24  ;;  %v269_v63 = vshrl.u32 %v253_v53, 9  ;;  %v222_v7 = vmul.u32 1935289751, %v206_v55  ;;  %v353_v24 = vmul.f32 %v736_v9, %v336_v49 }
  0x58   :  { %559 = vst [vmem:[#allocation6 + $0x38] sm:$0xff] %v543_v15  ;;  %v316_v62 = vmul.f32 1.1920929e-07, %v300_v2  ;;  %vm494_vm0 = vcmp.ne.f32.partialorder %v838_v60, 0.0  ;;  %v191_v21 = vshrl.u32 %v175_v8, 15  ;;  %v144_v57 = vshrl.u32 %v128_v11, 16 }
  0x59   :  { %v624_v18 = vpop.eup %623  ;;  %v285_v14 = vcvt.s32.f32 %v269_v63  ;;  %v238_v19 = vshrl.u32 %v222_v7, 15  ;;  %v412_v25 = vmul.f32 1.442695, %v385_v1  ;;  %v60_v28 = vadd.s32 112, %v724_v3 }
  0x5a   :  { %v455_v13 = vmul.f32 0.6931472, %v624_v18  ;;  %627 = vlog2.f32 %v316_v62  ;;  %v207_v30 = vxor.u32 %v191_v21, %v175_v8  ;;  %v386_v33 = vadd.f32 %v370_v5, %v353_v24 }
  0x5b   :  { %v301_v23 = vadd.f32 0.5, %v285_v14  ;;  %v254_v29 = vxor.u32 %v238_v19, %v222_v7  ;;  %v160_v26 = vxor.u32 %v144_v57, %v128_v11  ;;  %v354_v35 = vmul.f32 %v736_v9, %v337_v17 }
  0x5c   :  { %v478_v22 = vmul.f32 %v455_v13, %v430_v27  ;;  %v95_v36 = vmul.u32 128, %v60_v28  ;;  %v223_v41 = vmul.u32 1935289751, %v207_v30  ;;  %v371_v27 = vmul.f32 %v732_v6, %v932_v58  ;;  %v626_v32 = vpop.eup %625 }
  0x5d   :  { %v317_v39 = vmul.f32 1.1920929e-07, %v301_v23  ;;  %v270_v38 = vshrl.u32 %v254_v29, 9  ;;  %v176_v43 = vmul.u32 569420461, %v160_v26  ;;  %v61_v48 = vadd.s32 120, %v724_v3 }
  0x5e   :  { %v510_v34 = vsel %vm494_vm0, %v478_v22, -inf  ;;  %v111_v44 = vadd.s32 %v95_v36, %v726_v4  ;;  %v239_v45 = vshrl.u32 %v223_v41, 15  ;;  %v431_v49 = vadd.f32 1.0, %v622_v54 }
  0x5f   :  { %vm528_vm1 = vcmp.ge.f32.partialorder %v510_v34, %v803_v61  ;;  %629 = vlog2.f32 %v317_v39  ;;  %v286_v40 = vcvt.s32.f32 %v270_v38  ;;  %v192_v0 = vshrl.u32 %v176_v43, 15 }
  0x60   :  { %v544_v42 = vsel %vm528_vm1, 0.0, %v838_v60  ;;  %631 = vpow2.f32 %v412_v25  ;;  %v129_v47 = vadd.s32 %v740_v12, %v111_v44  ;;  %v255_v10 = vxor.u32 %v239_v45, %v223_v41 }
  0x61   :  { %560 = vst [vmem:[#allocation6 + $0x40] sm:$0xff] %v544_v42  ;;  %v302_v60 = vadd.f32 0.5, %v286_v40  ;;  %v414_v50 = vmul.f32 1.442695, %v386_v33  ;;  %v208_v52 = vxor.u32 %v192_v0, %v176_v43  ;;  %v387_v2 = vadd.f32 %v371_v27, %v354_v35 }
  0x62   :  { %v145_v53 = vshrl.u32 %v129_v47, 16  ;;  %v96_v15 = vmul.u32 128, %v61_v48  ;;  %v271_v59 = vshrl.u32 %v255_v10, 9  ;;  %v338_v62 = vsub.f32 1.0, %v951_v46 }
  0x63   :  { %v318_v56 = vmul.f32 1.1920929e-07, %v302_v60  ;;  %vm495_vm2 = vcmp.ne.f32.partialorder %v866_v16, 0.0  ;;  %v224_v63 = vmul.u32 1935289751, %v208_v52  ;;  %v432_v5 = vadd.f32 1.0, %v626_v32 }
  0x64   :  { %v628_v51 = vpop.eup %627  ;;  %v161_v1 = vxor.u32 %v145_v53, %v129_v47  ;;  %v112_v3 = vadd.s32 %v96_v15, %v726_v4  ;;  %v287_v18 = vcvt.s32.f32 %v271_v59  ;;  %v416_v14 = vmul.f32 1.442695, %v387_v2  ;;  %v964_v4 = vld [vmem:[%s1007_s4 + $0x78] sm:$0xff]  ;;  %s675_s4 = smov [#allocation6]  }
  0x65   :  { %v457_v55 = vmul.f32 0.6931472, %v628_v51  ;;  %633 = vlog2.f32 %v318_v56  ;;  %v240_v7 = vshrl.u32 %v224_v63, 15  ;;  %v355_v17 = vmul.f32 %v736_v9, %v338_v62  ;;  %s573_s1 = sshll.u32 %s675_s4, 4  ;;  %s574_s1 = int_to_ptr.vmem [resolvable:$true] %s573_s1 }
  0x66   :  { %635 = vpow2.f32 %v414_v50  ;;  %v177_v8 = vmul.u32 569420461, %v161_v1  ;;  %v130_v24 = vadd.s32 %v740_v12, %v112_v3  ;;  %v303_v13 = vadd.f32 0.5, %v287_v18  ;;  %s651_s2 = scalar_lea.vmem %s574_s1, 2048  ;;  %p656_p1 = scmp.lt.s32.totalorder %s574_s1, %s574_s1 }
  0x67   :  { %v479_v54 = vmul.f32 %v457_v55, %v431_v49  ;;  %v256_v21 = vxor.u32 %v240_v7, %v224_v63  ;;  %v372_v28 = vmul.f32 %v732_v6, %v951_v46  ;;  %vm496_vm4 = vcmp.ne.f32.partialorder %v882_v31, 0.0  ;;  %p652_p0 = scmp.ne.s32.totalorder %s574_s1, %s651_s2  ;;  %p657_p2 = scmp.lt.s32.totalorder %s651_s2, %s651_s2 }
  0x68   :  { %v193_v57 = vshrl.u32 %v177_v8, 15  ;;  %v146_v22 = vshrl.u32 %v130_v24, 16  ;;  %v319_v12 = vmul.f32 1.1920929e-07, %v303_v13  ;;  %v339_v39 = vsub.f32 1.0, %v964_v4 }
  0x69   :  { %v511_v11 = vsel %vm495_vm2, %v479_v54, -inf  ;;  %v630_v19 = vpop.eup %629  ;;  %v272_v30 = vshrl.u32 %v256_v21, 9  ;;  %v388_v27 = vadd.f32 %v372_v28, %v355_v17  ;;  %v373_v0 = vmul.f32 %v732_v6, %v964_v4  ;;  %p658_p3 = por %p657_p2, %p656_p1 }
  0x6a   :  { %vm529_vm3 = vcmp.ge.f32.partialorder %v511_v11, %v803_v61  ;;  %v459_v25 = vmul.f32 0.6931472, %v630_v19  ;;  %v632_v29 = vpop.eup %631  ;;  %v209_v33 = vxor.u32 %v193_v57, %v177_v8  ;;  %v162_v26 = vxor.u32 %v146_v22, %v130_v24 }
  0x6b   :  { %v545_v23 = vsel %vm529_vm3, 0.0, %v866_v16  ;;  %637 = vlog2.f32 %v319_v12  ;;  %v288_v35 = vcvt.s32.f32 %v272_v30  ;;  %v433_v41 = vadd.f32 1.0, %v632_v29  ;;  %p659_p4 = pnand %p658_p3, %p652_p0 }
  0x6c   :  { %561 = vst [vmem:[#allocation6 + $0x48] sm:$0xff] %v545_v23  ;;  %v480_v34 = vmul.f32 %v459_v25, %v432_v5  ;;  %v225_v36 = vmul.u32 1935289751, %v209_v33  ;;  %v178_v38 = vmul.u32 569420461, %v162_v26  ;;  %639 = vpow2.f32 %v416_v14 }
  0x6d   :  { %v304_v32 = vadd.f32 0.5, %v288_v35  ;;  %v356_v45 = vmul.f32 %v736_v9, %v339_v39  ;;  %vm497_vm6 = vcmp.ne.f32.partialorder %v905_v20, 0.0  ;;  %v418_v50 = vmul.f32 1.442695, %v388_v27 }
  0x6e   :  { %v512_v16 = vsel %vm496_vm4, %v480_v34, -inf  ;;  %v241_v42 = vshrl.u32 %v225_v36, 15  ;;  %v194_v43 = vshrl.u32 %v178_v38, 15  ;;  %vm498_vm8 = vcmp.ne.f32.partialorder %v915_v37, 0.0 }
  0x6f   :  { %vm530_vm5 = vcmp.ge.f32.partialorder %v512_v16, %v803_v61  ;;  %v634_v44 = vpop.eup %633  ;;  %v320_v49 = vmul.f32 1.1920929e-07, %v304_v32  ;;  %v389_v55 = vadd.f32 %v373_v0, %v356_v45  ;;  %vm499_vm10 = vcmp.ne.f32.partialorder %v932_v58, 0.0 }
  0x70   :  { %v546_v40 = vsel %vm530_vm5, 0.0, %v882_v31  ;;  %v636_v47 = vpop.eup %635  ;;  %v461_v48 = vmul.f32 0.6931472, %v634_v44  ;;  %v257_v60 = vxor.u32 %v241_v42, %v225_v36  ;;  %v210_v10 = vxor.u32 %v194_v43, %v178_v38 }
  0x71   :  { %562 = vst [vmem:[#allocation6 + $0x50] sm:$0xff] %v546_v40  ;;  %641 = vlog2.f32 %v320_v49  ;;  %v434_v53 = vadd.f32 1.0, %v636_v47  ;;  %v420_v18 = vmul.f32 1.442695, %v389_v55  ;;  %vm500_vm12 = vcmp.ne.f32.partialorder %v951_v46, 0.0 }
  0x72   :  { %v481_v51 = vmul.f32 %v461_v48, %v433_v41  ;;  %v273_v52 = vshrl.u32 %v257_v60, 9  ;;  %v226_v2 = vmul.u32 1935289751, %v210_v10  ;;  %643 = vpow2.f32 %v418_v50 }
  0x73   :  { %vm501_vm14 = vcmp.ne.f32.partialorder %v964_v4, 0.0 }
  0x74   :  { %v513_v31 = vsel %vm497_vm6, %v481_v51, -inf  ;;  %v289_v15 = vcvt.s32.f32 %v273_v52  ;;  %v242_v9 = vshrl.u32 %v226_v2, 15 }
  0x75   :  { %v638_v56 = vpop.eup %637  ;;  %vm531_vm7 = vcmp.ge.f32.partialorder %v513_v31, %v803_v61 }
  0x76   :  { %v547_v6 = vsel %vm531_vm7, 0.0, %v905_v20  ;;  %v463_v59 = vmul.f32 0.6931472, %v638_v56  ;;  %v305_v62 = vadd.f32 0.5, %v289_v15  ;;  %v258_v63 = vxor.u32 %v242_v9, %v226_v2  ;;  %v640_v1 = vpop.eup %639 }
  0x77   :  { %563 = vst [vmem:[#allocation6 + $0x58] sm:$0xff] %v547_v6  ;;  %v435_v24 = vadd.f32 1.0, %v640_v1 }
  0x78   :  { %v482_v3 = vmul.f32 %v463_v59, %v434_v53  ;;  %v321_v54 = vmul.f32 1.1920929e-07, %v305_v62  ;;  %v274_v5 = vshrl.u32 %v258_v63, 9 }
  0x7a   :  { %v514_v7 = vsel %vm498_vm8, %v482_v3, -inf  ;;  %645 = vlog2.f32 %v321_v54  ;;  %v290_v8 = vcvt.s32.f32 %v274_v5 }
  0x7b   :  { %vm532_vm9 = vcmp.ge.f32.partialorder %v514_v7, %v803_v61  ;;  %v642_v11 = vpop.eup %641  ;;  %647 = vpow2.f32 %v420_v18 }
  0x7c   :  { %v548_v20 = vsel %vm532_vm9, 0.0, %v915_v37  ;;  %v306_v13 = vadd.f32 0.5, %v290_v8  ;;  %v465_v14 = vmul.f32 0.6931472, %v642_v11  ;;  %v644_v19 = vpop.eup %643 }
  0x7d   :  { %564 = vst [vmem:[#allocation6 + $0x60] sm:$0xff] %v548_v20  ;;  %v436_v23 = vadd.f32 1.0, %v644_v19 }
  0x7e   :  { %v322_v17 = vmul.f32 1.1920929e-07, %v306_v13  ;;  %v483_v21 = vmul.f32 %v465_v14, %v435_v24 }
  0x80   :  { %649 = vlog2.f32 %v322_v17  ;;  %v515_v57 = vsel %vm499_vm10, %v483_v21, -inf }
  0x81   :  { %vm533_vm11 = vcmp.ge.f32.partialorder %v515_v57, %v803_v61 }
  0x82   :  { %v549_v22 = vsel %vm533_vm11, 0.0, %v932_v58 }
  0x83   :  { %565 = vst [vmem:[#allocation6 + $0x68] sm:$0xff] %v549_v22 }
  0x84   :  { %v646_v25 = vpop.eup %645 }
  0x85   :  { %v467_v12 = vmul.f32 0.6931472, %v646_v25  ;;  %v648_v37 = vpop.eup %647 }
  0x86   :  { %v437_v30 = vadd.f32 1.0, %v648_v37 }
  0x87   :  { %v484_v28 = vmul.f32 %v467_v12, %v436_v23 }
  0x89   :  { %v516_v29 = vsel %vm500_vm12, %v484_v28, -inf }
  0x8a   :  { %v650_v33 = vpop.eup %649  ;;  %vm534_vm13 = vcmp.ge.f32.partialorder %v516_v29, %v803_v61 }
  0x8b   :  { %v550_v26 = vsel %vm534_vm13, 0.0, %v951_v46  ;;  %v469_v34 = vmul.f32 0.6931472, %v650_v33 }
  0x8c   :  { %566 = vst [vmem:[#allocation6 + $0x70] sm:$0xff] %v550_v26 }
  0x8d   :  { %v485_v58 = vmul.f32 %v469_v34, %v437_v30 }
  0x8f   :  { %v517_v39 = vsel %vm501_vm14, %v485_v58, -inf }
  0x90   :  { %vm535_vm15 = vcmp.ge.f32.partialorder %v517_v39, %v803_v61 }
  0x91   :  { %v551_v35 = vsel %vm535_vm15, 0.0, %v964_v4 }
  0x92   :  { %567 = vst [vmem:[#allocation6 + $0x78] sm:$0xff] %v551_v35 }
  0x93   :  { %662 = shalt.err (!%p659_p4)
}
  0x94   :  { %s663_s7 = scalar_lea.hbm %s1008_s5, 2048 }
  0x95   :  { %p664_p5 = scmp.ne.s32.totalorder %s1008_s5, %s663_s7  ;;  %p667_p6 = scmp.lt.u32.totalorder %s663_s7, %s1008_s5 }
  0x97   :  { %p669_p7 = pnand %p667_p6, %p664_p5 }
  0x99   :  { %672 = shalt.err (!%p669_p7)
}
  0x9a   :  { %s676_s12 = smov 128   ;;  %s677_s13 = smov 8  }
  0x9b   :  { %579 = dma.vmem_to_hbm [thread:$0]  %s574_s1, 2048, %s1008_s5, [#allocation7], %s676_s12, %s676_s12, %s677_s13  }
  0x9c   :  { %673 = dma.done.wait [#allocation7], 2048  }
  0x9d   :  { %674 = vsyncadd [#allocation7], 4294965248 }
  0x9e   :  { %583 = vsyncpa [#allocation7], 1 }

</bundles_post_ra>
